<compile_context>
chip_gen: v7x
topology: tpu7x:2x2x1
jax: 0.10.0
libtpu: 0.0.40
codegen_flags: <defaults>
</compile_context>

<pallas_src>
import functools

import jax
import jax.numpy as jnp
from jax.experimental import pallas as pl
from jax.experimental.pallas import tpu as pltpu


# ----------------------------------------------------------------------------
# Fused kernel.  Grid = (3,) over (pos, neg, regex) LSTMs.
# Per grid step: unrolled 8-step LSTM recurrence -> hid += h_last @ fc1_w[li].
# Last grid step: + fc1_b -> ReLU -> fc2 (lane-padded) -> output.
# ----------------------------------------------------------------------------
def _dqn_fused_kernel(gates_ref, whh_ref, w1_ref, b1_ref, w2_ref, b2_ref,
                      o_ref, hid_acc, *, seq_len, batch, hidden):
    S, B, H = seq_len, batch, hidden
    li = pl.program_id(0)

    @pl.when(li == 0)
    def _():
        hid_acc[...] = jnp.zeros_like(hid_acc)

    w_hh = whh_ref[...]                                   # (H, 4H) bf16

    h = jnp.zeros((B, H), jnp.float32)
    c = jnp.zeros((B, H), jnp.float32)
    # Fully unrolled recurrence (S static & small): one bf16 matmul per step,
    # gate math in f32.  PyTorch gate order [i, f, g, o].
    for t in range(S):
        g = gates_ref[t]                                  # (B, 4H) f32, tile-aligned view
        if t > 0:                                         # h_0 == 0 -> skip first matmul
            g = g + jnp.dot(h.astype(jnp.bfloat16), w_hh,
                            preferred_element_type=jnp.float32)
        i_g = jax.nn.sigmoid(g[:, 0 * H:1 * H])
        f_g = jax.nn.sigmoid(g[:, 1 * H:2 * H])
        g_g = jnp.tanh(g[:, 2 * H:3 * H])
        o_g = jax.nn.sigmoid(g[:, 3 * H:4 * H])
        c = f_g * c + i_g * g_g
        h = o_g * jnp.tanh(c)

    # Partial fc1: this LSTM's (H, H) block, accumulated in f32 VMEM scratch.
    hid_acc[...] += jnp.dot(h.astype(jnp.bfloat16), w1_ref[...],
                            preferred_element_type=jnp.float32)

    @pl.when(li == pl.num_programs(0) - 1)
    def _():
        hid = jnp.maximum(hid_acc[...] + b1_ref[...], 0.0)
        o_ref[...] = jnp.dot(hid.astype(jnp.bfloat16), w2_ref[...],
                             preferred_element_type=jnp.float32) + b2_ref[...]


def dqn_fused_call(gates_all, w_hh_t, fc1_w_t, fc1_b, fc2_w_t_pad, fc2_b_pad,
                   *, seq_len, batch, hidden):
    S, B, H = seq_len, batch, hidden
    out_pad = fc2_w_t_pad.shape[1]
    return pl.pallas_call(
        functools.partial(_dqn_fused_kernel,
                          seq_len=S, batch=B, hidden=H),
        grid=(3,),
        in_specs=[
            # Per-LSTM blocks (double-buffered across the grid -> DMA overlap).
            pl.BlockSpec((None, S, B, 4 * H), lambda li: (li, 0, 0, 0)),  # gates
            pl.BlockSpec((None, H, 4 * H), lambda li: (li, 0, 0)),        # w_hh (bf16)
            pl.BlockSpec((None, H, H), lambda li: (li, 0, 0)),            # fc1 block (bf16)
            # Shared head params (same block every step -> fetched once).
            pl.BlockSpec((1, H), lambda li: (0, 0)),                      # fc1 bias
            pl.BlockSpec((H, out_pad), lambda li: (0, 0)),                # fc2 (bf16, padded)
            pl.BlockSpec((1, out_pad), lambda li: (0, 0)),                # fc2 bias (padded)
        ],
        out_specs=pl.BlockSpec((B, out_pad), lambda li: (0, 0)),
        out_shape=jax.ShapeDtypeStruct((B, out_pad), jnp.float32),
        scratch_shapes=[pltpu.VMEM((B, H), jnp.float32)],                 # hid accumulator
        compiler_params=pltpu.CompilerParams(
            dimension_semantics=("arbitrary",)),
    )(gates_all, w_hh_t, fc1_w_t, fc1_b, fc2_w_t_pad, fc2_b_pad)


# ----------------------------------------------------------------------------
# Parameter construction (deterministic, synthetic; PyTorch-equivalent layout).
# ----------------------------------------------------------------------------
def init_params(key, num_symbols=12, embedding_dim=4, hidden_dim=128,
                num_actions=12, out_pad=128):
    ks = jax.random.split(key, 17)
    H, E = hidden_dim, embedding_dim

    def u(k, shape, scale):
        return jax.random.uniform(k, shape, jnp.float32, -scale, scale)

    s_l = 1.0 / jnp.sqrt(H)
    emb = jax.random.normal(ks[0], (num_symbols, E), jnp.float32)

    tables, whh_l = [], []
    for idx in range(3):                        # 0=pos, 1=neg, 2=regex (concat order)
        base = 1 + 4 * idx
        w_ih = u(ks[base + 0], (4 * H, E), s_l)         # PyTorch layout (4H, E)
        w_hh = u(ks[base + 1], (4 * H, H), s_l)         # PyTorch layout (4H, H)
        b_ih = u(ks[base + 2], (4 * H,), s_l)
        b_hh = u(ks[base + 3], (4 * H,), s_l)
        # Precomputed token -> gate-preactivation table (bias folded ONCE here).
        tables.append(emb @ w_ih.T + (b_ih + b_hh)[None, :])   # (num_symbols, 4H)
        whh_l.append(w_hh.T)                                    # (H, 4H) for h @ W

    params = {
        "gate_table": jnp.stack(tables),                         # (3, num_symbols, 4H) f32
        "w_hh_t": jnp.stack(whh_l).astype(jnp.bfloat16),         # (3, H, 4H) bf16
    }

    s_f1 = 1.0 / jnp.sqrt(3 * H)
    s_f2 = 1.0 / jnp.sqrt(H)
    fc1_w_t = u(ks[13], (3 * H, H), s_f1)                        # (3H, H) = W_fc1.T
    params["fc1_w_t"] = fc1_w_t.reshape(3, H, H).astype(jnp.bfloat16)   # per-LSTM blocks
    params["fc1_b"] = u(ks[14], (1, H), s_f1)                    # f32
    fc2_w_t = u(ks[15], (H, num_actions), s_f2)
    fc2_b = u(ks[16], (1, num_actions), s_f2)
    # Lane-dense (128-wide) padded fc2; real columns are [:num_actions]; pad = exact 0.
    params["fc2_w_t_pad"] = (jnp.zeros((H, out_pad), jnp.bfloat16)
                             .at[:, :num_actions].set(fc2_w_t.astype(jnp.bfloat16)))
    params["fc2_b_pad"] = (jnp.zeros((1, out_pad), jnp.float32)
                           .at[:, :num_actions].set(fc2_b))
    return params


# ----------------------------------------------------------------------------
# Forward pass (mirrors DQN.forward).
# ----------------------------------------------------------------------------
@functools.partial(jax.jit, static_argnames=("num_actions",))
def dqn_forward(params, regex, pos, neg, *, num_actions=12):
    B, S = pos.shape
    H = params["w_hh_t"].shape[1]

    # Embedding + input projection == gather from the precomputed gate table.
    # Time-major tokens, stacked in concat order (pos, neg, regex).
    tokens_tm = jnp.stack([pos.T, neg.T, regex.T], axis=0)        # (3, S, B)
    gates_all = jax.vmap(lambda tbl, tok: tbl[tok])(
        params["gate_table"], tokens_tm)                          # (3, S, B, 4H) f32

    out_pad = dqn_fused_call(
        gates_all, params["w_hh_t"], params["fc1_w_t"], params["fc1_b"],
        params["fc2_w_t_pad"], params["fc2_b_pad"],
        seq_len=S, batch=B, hidden=H)                             # (B, 128)
    return out_pad[:, :num_actions]


if __name__ == "__main__":
    key = jax.random.PRNGKey(0)
    k_param, k_r, k_p, k_n = jax.random.split(key, 4)

    NUM_SYMBOLS, EMB, HIDDEN, NUM_ACTIONS = 12, 4, 128, 12
    B, S = 2, 8

    params = init_params(k_param, NUM_SYMBOLS, EMB, HIDDEN, NUM_ACTIONS)

    regex = jax.random.randint(k_r, (B, S), 0, NUM_SYMBOLS, dtype=jnp.int32)
    pos = jax.random.randint(k_p, (B, S), 0, NUM_SYMBOLS, dtype=jnp.int32)
    neg = jax.random.randint(k_n, (B, S), 0, NUM_SYMBOLS, dtype=jnp.int32)

    out = dqn_forward(params, regex, pos, neg, num_actions=NUM_ACTIONS)
    jax.block_until_ready(out)
    assert out.shape == (B, NUM_ACTIONS), out.shape
    print("KERNEL_OK")
</pallas_src>

<mosaic_0001>
module attributes {stable_mosaic.version = 11 : i64} {
  func.func @_dqn_fused_kernel(%arg0: i32, %arg1: memref<1x8x2x512xf32, #tpu.memory_space<vmem>>, %arg2: memref<1x128x512xbf16, #tpu.memory_space<vmem>>, %arg3: memref<1x128x128xbf16, #tpu.memory_space<vmem>>, %arg4: memref<1x128xf32, #tpu.memory_space<vmem>>, %arg5: memref<128x128xbf16, #tpu.memory_space<vmem>>, %arg6: memref<1x128xf32, #tpu.memory_space<vmem>>, %arg7: memref<2x128xf32, #tpu.memory_space<vmem>>, %arg8: memref<2x128xf32, #tpu.memory_space<vmem>>) attributes {dimension_semantics = [#tpu.dimension_semantics<arbitrary>], iteration_bounds = array<i64: 3>, scalar_prefetch = 0 : i64, scratch_operands = 1 : i64, tpu.core_type = #tpu.core_type<tc>, window_params = [{transform_indices = @transform_0, window_bounds = array<i64: 1, 8, 2, 512>}, {transform_indices = @transform_1, window_bounds = array<i64: 1, 128, 512>}, {transform_indices = @transform_2, window_bounds = array<i64: 1, 128, 128>}, {pipeline_mode = #tpu.pipeline_mode<synchronous>, transform_indices = @transform_3, window_bounds = array<i64: 1, 128>}, {pipeline_mode = #tpu.pipeline_mode<synchronous>, transform_indices = @transform_4, window_bounds = array<i64: 128, 128>}, {pipeline_mode = #tpu.pipeline_mode<synchronous>, transform_indices = @transform_5, window_bounds = array<i64: 1, 128>}, {pipeline_mode = #tpu.pipeline_mode<synchronous>, transform_indices = @transform_6, window_bounds = array<i64: 2, 128>}]} {
    %c0_i32 = arith.constant 0 : i32
    %0 = arith.cmpi eq, %arg0, %c0_i32 : i32
    %1 = arith.extui %0 : i1 to i32
    %c0_i32_0 = arith.constant 0 : i32
    %2 = arith.cmpi ne, %1, %c0_i32_0 : i32
    scf.if %2 {
      %cst_68 = arith.constant 0.000000e+00 : f32
      %253 = vector.broadcast %cst_68 : f32 to vector<2x128xf32>
      %c0_69 = arith.constant 0 : index
      %c0_70 = arith.constant 0 : index
      %254 = vector.load %arg8[%c0_69, %c0_70] : memref<2x128xf32, #tpu.memory_space<vmem>>, vector<2x128xf32>
      tpu.vector_store %arg8[%c0_69, %c0_70], %253 {strides = array<i32>} : memref<2x128xf32, #tpu.memory_space<vmem>>, vector<2x128xf32>,
    } else {
    }
    %c0 = arith.constant 0 : index
    %c0_1 = arith.constant 0 : index
    %c0_2 = arith.constant 0 : index
    %3 = vector.load %arg2[%c0, %c0_1, %c0_2] : memref<1x128x512xbf16, #tpu.memory_space<vmem>>, vector<1x128x512xbf16>
    %4 = vector.shape_cast %3 : vector<1x128x512xbf16> to vector<128x512xbf16>
    %cst = arith.constant 0.000000e+00 : f32
    %5 = vector.broadcast %cst : f32 to vector<2x128xf32>
    %c0_3 = arith.constant 0 : index
    %c0_4 = arith.constant 0 : index
    %c0_5 = arith.constant 0 : index
    %c0_6 = arith.constant 0 : index
    %6 = vector.load %arg1[%c0_3, %c0_4, %c0_5, %c0_6] : memref<1x8x2x512xf32, #tpu.memory_space<vmem>>, vector<1x1x2x512xf32>
    %7 = vector.shape_cast %6 : vector<1x1x2x512xf32> to vector<2x512xf32>
    %8 = vector.extract_strided_slice %7 {offsets = [0, 0], sizes = [2, 128], strides = [1, 1]} : vector<2x512xf32> to vector<2x128xf32>
    %9 = arith.negf %8 : vector<2x128xf32>
    %10 = math.exp %9 : vector<2x128xf32>
    %cst_7 = arith.constant 1.000000e+00 : f32
    %11 = vector.broadcast %cst_7 : f32 to vector<2x128xf32>
    %12 = arith.addf %11, %10 : vector<2x128xf32>
    %13 = arith.divf %11, %12 : vector<2x128xf32>
    %14 = vector.extract_strided_slice %7 {offsets = [0, 128], sizes = [2, 128], strides = [1, 1]} : vector<2x512xf32> to vector<2x128xf32>
    %15 = arith.negf %14 : vector<2x128xf32>
    %16 = math.exp %15 : vector<2x128xf32>
    %cst_8 = arith.constant 1.000000e+00 : f32
    %17 = vector.broadcast %cst_8 : f32 to vector<2x128xf32>
    %18 = arith.addf %17, %16 : vector<2x128xf32>
    %19 = arith.divf %17, %18 : vector<2x128xf32>
    %20 = vector.extract_strided_slice %7 {offsets = [0, 256], sizes = [2, 128], strides = [1, 1]} : vector<2x512xf32> to vector<2x128xf32>
    %21 = math.tanh %20 : vector<2x128xf32>
    %22 = vector.extract_strided_slice %7 {offsets = [0, 384], sizes = [2, 128], strides = [1, 1]} : vector<2x512xf32> to vector<2x128xf32>
    %23 = arith.negf %22 : vector<2x128xf32>
    %24 = math.exp %23 : vector<2x128xf32>
    %cst_9 = arith.constant 1.000000e+00 : f32
    %25 = vector.broadcast %cst_9 : f32 to vector<2x128xf32>
    %26 = arith.addf %25, %24 : vector<2x128xf32>
    %27 = arith.divf %25, %26 : vector<2x128xf32>
    %28 = arith.mulf %19, %5 : vector<2x128xf32>
    %29 = arith.mulf %13, %21 : vector<2x128xf32>
    %30 = arith.addf %28, %29 : vector<2x128xf32>
    %31 = math.tanh %30 : vector<2x128xf32>
    %32 = arith.mulf %27, %31 : vector<2x128xf32>
    %c0_10 = arith.constant 0 : index
    %c1 = arith.constant 1 : index
    %c0_11 = arith.constant 0 : index
    %c0_12 = arith.constant 0 : index
    %33 = vector.load %arg1[%c0_10, %c1, %c0_11, %c0_12] : memref<1x8x2x512xf32, #tpu.memory_space<vmem>>, vector<1x1x2x512xf32>
    %34 = vector.shape_cast %33 : vector<1x1x2x512xf32> to vector<2x512xf32>
    %35 = arith.truncf %32 : vector<2x128xf32> to vector<2x128xbf16>
    %cst_13 = arith.constant dense<0.000000e+00> : vector<2x512xf32>
    %36 = tpu.matmul %35, %4, %cst_13 {dimension_numbers = #tpu.dot_dimension_numbers<[1], [0], [0], [1], [0, 0, 1, 1], [], []>} : vector<2x128xbf16>, vector<128x512xbf16>, vector<2x512xf32> -> vector<2x512xf32>
    %37 = arith.addf %34, %36 : vector<2x512xf32>
    %38 = vector.extract_strided_slice %37 {offsets = [0, 0], sizes = [2, 128], strides = [1, 1]} : vector<2x512xf32> to vector<2x128xf32>
    %39 = arith.negf %38 : vector<2x128xf32>
    %40 = math.exp %39 : vector<2x128xf32>
    %cst_14 = arith.constant 1.000000e+00 : f32
    %41 = vector.broadcast %cst_14 : f32 to vector<2x128xf32>
    %42 = arith.addf %41, %40 : vector<2x128xf32>
    %43 = arith.divf %41, %42 : vector<2x128xf32>
    %44 = vector.extract_strided_slice %37 {offsets = [0, 128], sizes = [2, 128], strides = [1, 1]} : vector<2x512xf32> to vector<2x128xf32>
    %45 = arith.negf %44 : vector<2x128xf32>
    %46 = math.exp %45 : vector<2x128xf32>
    %cst_15 = arith.constant 1.000000e+00 : f32
    %47 = vector.broadcast %cst_15 : f32 to vector<2x128xf32>
    %48 = arith.addf %47, %46 : vector<2x128xf32>
    %49 = arith.divf %47, %48 : vector<2x128xf32>
    %50 = vector.extract_strided_slice %37 {offsets = [0, 256], sizes = [2, 128], strides = [1, 1]} : vector<2x512xf32> to vector<2x128xf32>
    %51 = math.tanh %50 : vector<2x128xf32>
    %52 = vector.extract_strided_slice %37 {offsets = [0, 384], sizes = [2, 128], strides = [1, 1]} : vector<2x512xf32> to vector<2x128xf32>
    %53 = arith.negf %52 : vector<2x128xf32>
    %54 = math.exp %53 : vector<2x128xf32>
    %cst_16 = arith.constant 1.000000e+00 : f32
    %55 = vector.broadcast %cst_16 : f32 to vector<2x128xf32>
    %56 = arith.addf %55, %54 : vector<2x128xf32>
    %57 = arith.divf %55, %56 : vector<2x128xf32>
    %58 = arith.mulf %49, %30 : vector<2x128xf32>
    %59 = arith.mulf %43, %51 : vector<2x128xf32>
    %60 = arith.addf %58, %59 : vector<2x128xf32>
    %61 = math.tanh %60 : vector<2x128xf32>
    %62 = arith.mulf %57, %61 : vector<2x128xf32>
    %c0_17 = arith.constant 0 : index
    %c2 = arith.constant 2 : index
    %c0_18 = arith.constant 0 : index
    %c0_19 = arith.constant 0 : index
    %63 = vector.load %arg1[%c0_17, %c2, %c0_18, %c0_19] : memref<1x8x2x512xf32, #tpu.memory_space<vmem>>, vector<1x1x2x512xf32>
    %64 = vector.shape_cast %63 : vector<1x1x2x512xf32> to vector<2x512xf32>
    %65 = arith.truncf %62 : vector<2x128xf32> to vector<2x128xbf16>
    %cst_20 = arith.constant dense<0.000000e+00> : vector<2x512xf32>
    %66 = tpu.matmul %65, %4, %cst_20 {dimension_numbers = #tpu.dot_dimension_numbers<[1], [0], [0], [1], [0, 0, 1, 1], [], []>} : vector<2x128xbf16>, vector<128x512xbf16>, vector<2x512xf32> -> vector<2x512xf32>
    %67 = arith.addf %64, %66 : vector<2x512xf32>
    %68 = vector.extract_strided_slice %67 {offsets = [0, 0], sizes = [2, 128], strides = [1, 1]} : vector<2x512xf32> to vector<2x128xf32>
    %69 = arith.negf %68 : vector<2x128xf32>
    %70 = math.exp %69 : vector<2x128xf32>
    %cst_21 = arith.constant 1.000000e+00 : f32
    %71 = vector.broadcast %cst_21 : f32 to vector<2x128xf32>
    %72 = arith.addf %71, %70 : vector<2x128xf32>
    %73 = arith.divf %71, %72 : vector<2x128xf32>
    %74 = vector.extract_strided_slice %67 {offsets = [0, 128], sizes = [2, 128], strides = [1, 1]} : vector<2x512xf32> to vector<2x128xf32>
    %75 = arith.negf %74 : vector<2x128xf32>
    %76 = math.exp %75 : vector<2x128xf32>
    %cst_22 = arith.constant 1.000000e+00 : f32
    %77 = vector.broadcast %cst_22 : f32 to vector<2x128xf32>
    %78 = arith.addf %77, %76 : vector<2x128xf32>
    %79 = arith.divf %77, %78 : vector<2x128xf32>
    %80 = vector.extract_strided_slice %67 {offsets = [0, 256], sizes = [2, 128], strides = [1, 1]} : vector<2x512xf32> to vector<2x128xf32>
    %81 = math.tanh %80 : vector<2x128xf32>
    %82 = vector.extract_strided_slice %67 {offsets = [0, 384], sizes = [2, 128], strides = [1, 1]} : vector<2x512xf32> to vector<2x128xf32>
    %83 = arith.negf %82 : vector<2x128xf32>
    %84 = math.exp %83 : vector<2x128xf32>
    %cst_23 = arith.constant 1.000000e+00 : f32
    %85 = vector.broadcast %cst_23 : f32 to vector<2x128xf32>
    %86 = arith.addf %85, %84 : vector<2x128xf32>
    %87 = arith.divf %85, %86 : vector<2x128xf32>
    %88 = arith.mulf %79, %60 : vector<2x128xf32>
    %89 = arith.mulf %73, %81 : vector<2x128xf32>
    %90 = arith.addf %88, %89 : vector<2x128xf32>
    %91 = math.tanh %90 : vector<2x128xf32>
    %92 = arith.mulf %87, %91 : vector<2x128xf32>
    %c0_24 = arith.constant 0 : index
    %c3 = arith.constant 3 : index
    %c0_25 = arith.constant 0 : index
    %c0_26 = arith.constant 0 : index
    %93 = vector.load %arg1[%c0_24, %c3, %c0_25, %c0_26] : memref<1x8x2x512xf32, #tpu.memory_space<vmem>>, vector<1x1x2x512xf32>
    %94 = vector.shape_cast %93 : vector<1x1x2x512xf32> to vector<2x512xf32>
    %95 = arith.truncf %92 : vector<2x128xf32> to vector<2x128xbf16>
    %cst_27 = arith.constant dense<0.000000e+00> : vector<2x512xf32>
    %96 = tpu.matmul %95, %4, %cst_27 {dimension_numbers = #tpu.dot_dimension_numbers<[1], [0], [0], [1], [0, 0, 1, 1], [], []>} : vector<2x128xbf16>, vector<128x512xbf16>, vector<2x512xf32> -> vector<2x512xf32>
    %97 = arith.addf %94, %96 : vector<2x512xf32>
    %98 = vector.extract_strided_slice %97 {offsets = [0, 0], sizes = [2, 128], strides = [1, 1]} : vector<2x512xf32> to vector<2x128xf32>
    %99 = arith.negf %98 : vector<2x128xf32>
    %100 = math.exp %99 : vector<2x128xf32>
    %cst_28 = arith.constant 1.000000e+00 : f32
    %101 = vector.broadcast %cst_28 : f32 to vector<2x128xf32>
    %102 = arith.addf %101, %100 : vector<2x128xf32>
    %103 = arith.divf %101, %102 : vector<2x128xf32>
    %104 = vector.extract_strided_slice %97 {offsets = [0, 128], sizes = [2, 128], strides = [1, 1]} : vector<2x512xf32> to vector<2x128xf32>
    %105 = arith.negf %104 : vector<2x128xf32>
    %106 = math.exp %105 : vector<2x128xf32>
    %cst_29 = arith.constant 1.000000e+00 : f32
    %107 = vector.broadcast %cst_29 : f32 to vector<2x128xf32>
    %108 = arith.addf %107, %106 : vector<2x128xf32>
    %109 = arith.divf %107, %108 : vector<2x128xf32>
    %110 = vector.extract_strided_slice %97 {offsets = [0, 256], sizes = [2, 128], strides = [1, 1]} : vector<2x512xf32> to vector<2x128xf32>
    %111 = math.tanh %110 : vector<2x128xf32>
    %112 = vector.extract_strided_slice %97 {offsets = [0, 384], sizes = [2, 128], strides = [1, 1]} : vector<2x512xf32> to vector<2x128xf32>
    %113 = arith.negf %112 : vector<2x128xf32>
    %114 = math.exp %113 : vector<2x128xf32>
    %cst_30 = arith.constant 1.000000e+00 : f32
    %115 = vector.broadcast %cst_30 : f32 to vector<2x128xf32>
    %116 = arith.addf %115, %114 : vector<2x128xf32>
    %117 = arith.divf %115, %116 : vector<2x128xf32>
    %118 = arith.mulf %109, %90 : vector<2x128xf32>
    %119 = arith.mulf %103, %111 : vector<2x128xf32>
    %120 = arith.addf %118, %119 : vector<2x128xf32>
    %121 = math.tanh %120 : vector<2x128xf32>
    %122 = arith.mulf %117, %121 : vector<2x128xf32>
    %c0_31 = arith.constant 0 : index
    %c4 = arith.constant 4 : index
    %c0_32 = arith.constant 0 : index
    %c0_33 = arith.constant 0 : index
    %123 = vector.load %arg1[%c0_31, %c4, %c0_32, %c0_33] : memref<1x8x2x512xf32, #tpu.memory_space<vmem>>, vector<1x1x2x512xf32>
    %124 = vector.shape_cast %123 : vector<1x1x2x512xf32> to vector<2x512xf32>
    %125 = arith.truncf %122 : vector<2x128xf32> to vector<2x128xbf16>
    %cst_34 = arith.constant dense<0.000000e+00> : vector<2x512xf32>
    %126 = tpu.matmul %125, %4, %cst_34 {dimension_numbers = #tpu.dot_dimension_numbers<[1], [0], [0], [1], [0, 0, 1, 1], [], []>} : vector<2x128xbf16>, vector<128x512xbf16>, vector<2x512xf32> -> vector<2x512xf32>
    %127 = arith.addf %124, %126 : vector<2x512xf32>
    %128 = vector.extract_strided_slice %127 {offsets = [0, 0], sizes = [2, 128], strides = [1, 1]} : vector<2x512xf32> to vector<2x128xf32>
    %129 = arith.negf %128 : vector<2x128xf32>
    %130 = math.exp %129 : vector<2x128xf32>
    %cst_35 = arith.constant 1.000000e+00 : f32
    %131 = vector.broadcast %cst_35 : f32 to vector<2x128xf32>
    %132 = arith.addf %131, %130 : vector<2x128xf32>
    %133 = arith.divf %131, %132 : vector<2x128xf32>
    %134 = vector.extract_strided_slice %127 {offsets = [0, 128], sizes = [2, 128], strides = [1, 1]} : vector<2x512xf32> to vector<2x128xf32>
    %135 = arith.negf %134 : vector<2x128xf32>
    %136 = math.exp %135 : vector<2x128xf32>
    %cst_36 = arith.constant 1.000000e+00 : f32
    %137 = vector.broadcast %cst_36 : f32 to vector<2x128xf32>
    %138 = arith.addf %137, %136 : vector<2x128xf32>
    %139 = arith.divf %137, %138 : vector<2x128xf32>
    %140 = vector.extract_strided_slice %127 {offsets = [0, 256], sizes = [2, 128], strides = [1, 1]} : vector<2x512xf32> to vector<2x128xf32>
    %141 = math.tanh %140 : vector<2x128xf32>
    %142 = vector.extract_strided_slice %127 {offsets = [0, 384], sizes = [2, 128], strides = [1, 1]} : vector<2x512xf32> to vector<2x128xf32>
    %143 = arith.negf %142 : vector<2x128xf32>
    %144 = math.exp %143 : vector<2x128xf32>
    %cst_37 = arith.constant 1.000000e+00 : f32
    %145 = vector.broadcast %cst_37 : f32 to vector<2x128xf32>
    %146 = arith.addf %145, %144 : vector<2x128xf32>
    %147 = arith.divf %145, %146 : vector<2x128xf32>
    %148 = arith.mulf %139, %120 : vector<2x128xf32>
    %149 = arith.mulf %133, %141 : vector<2x128xf32>
    %150 = arith.addf %148, %149 : vector<2x128xf32>
    %151 = math.tanh %150 : vector<2x128xf32>
    %152 = arith.mulf %147, %151 : vector<2x128xf32>
    %c0_38 = arith.constant 0 : index
    %c5 = arith.constant 5 : index
    %c0_39 = arith.constant 0 : index
    %c0_40 = arith.constant 0 : index
    %153 = vector.load %arg1[%c0_38, %c5, %c0_39, %c0_40] : memref<1x8x2x512xf32, #tpu.memory_space<vmem>>, vector<1x1x2x512xf32>
    %154 = vector.shape_cast %153 : vector<1x1x2x512xf32> to vector<2x512xf32>
    %155 = arith.truncf %152 : vector<2x128xf32> to vector<2x128xbf16>
    %cst_41 = arith.constant dense<0.000000e+00> : vector<2x512xf32>
    %156 = tpu.matmul %155, %4, %cst_41 {dimension_numbers = #tpu.dot_dimension_numbers<[1], [0], [0], [1], [0, 0, 1, 1], [], []>} : vector<2x128xbf16>, vector<128x512xbf16>, vector<2x512xf32> -> vector<2x512xf32>
    %157 = arith.addf %154, %156 : vector<2x512xf32>
    %158 = vector.extract_strided_slice %157 {offsets = [0, 0], sizes = [2, 128], strides = [1, 1]} : vector<2x512xf32> to vector<2x128xf32>
    %159 = arith.negf %158 : vector<2x128xf32>
    %160 = math.exp %159 : vector<2x128xf32>
    %cst_42 = arith.constant 1.000000e+00 : f32
    %161 = vector.broadcast %cst_42 : f32 to vector<2x128xf32>
    %162 = arith.addf %161, %160 : vector<2x128xf32>
    %163 = arith.divf %161, %162 : vector<2x128xf32>
    %164 = vector.extract_strided_slice %157 {offsets = [0, 128], sizes = [2, 128], strides = [1, 1]} : vector<2x512xf32> to vector<2x128xf32>
    %165 = arith.negf %164 : vector<2x128xf32>
    %166 = math.exp %165 : vector<2x128xf32>
    %cst_43 = arith.constant 1.000000e+00 : f32
    %167 = vector.broadcast %cst_43 : f32 to vector<2x128xf32>
    %168 = arith.addf %167, %166 : vector<2x128xf32>
    %169 = arith.divf %167, %168 : vector<2x128xf32>
    %170 = vector.extract_strided_slice %157 {offsets = [0, 256], sizes = [2, 128], strides = [1, 1]} : vector<2x512xf32> to vector<2x128xf32>
    %171 = math.tanh %170 : vector<2x128xf32>
    %172 = vector.extract_strided_slice %157 {offsets = [0, 384], sizes = [2, 128], strides = [1, 1]} : vector<2x512xf32> to vector<2x128xf32>
    %173 = arith.negf %172 : vector<2x128xf32>
    %174 = math.exp %173 : vector<2x128xf32>
    %cst_44 = arith.constant 1.000000e+00 : f32
    %175 = vector.broadcast %cst_44 : f32 to vector<2x128xf32>
    %176 = arith.addf %175, %174 : vector<2x128xf32>
    %177 = arith.divf %175, %176 : vector<2x128xf32>
    %178 = arith.mulf %169, %150 : vector<2x128xf32>
    %179 = arith.mulf %163, %171 : vector<2x128xf32>
    %180 = arith.addf %178, %179 : vector<2x128xf32>
    %181 = math.tanh %180 : vector<2x128xf32>
    %182 = arith.mulf %177, %181 : vector<2x128xf32>
    %c0_45 = arith.constant 0 : index
    %c6 = arith.constant 6 : index
    %c0_46 = arith.constant 0 : index
    %c0_47 = arith.constant 0 : index
    %183 = vector.load %arg1[%c0_45, %c6, %c0_46, %c0_47] : memref<1x8x2x512xf32, #tpu.memory_space<vmem>>, vector<1x1x2x512xf32>
    %184 = vector.shape_cast %183 : vector<1x1x2x512xf32> to vector<2x512xf32>
    %185 = arith.truncf %182 : vector<2x128xf32> to vector<2x128xbf16>
    %cst_48 = arith.constant dense<0.000000e+00> : vector<2x512xf32>
    %186 = tpu.matmul %185, %4, %cst_48 {dimension_numbers = #tpu.dot_dimension_numbers<[1], [0], [0], [1], [0, 0, 1, 1], [], []>} : vector<2x128xbf16>, vector<128x512xbf16>, vector<2x512xf32> -> vector<2x512xf32>
    %187 = arith.addf %184, %186 : vector<2x512xf32>
    %188 = vector.extract_strided_slice %187 {offsets = [0, 0], sizes = [2, 128], strides = [1, 1]} : vector<2x512xf32> to vector<2x128xf32>
    %189 = arith.negf %188 : vector<2x128xf32>
    %190 = math.exp %189 : vector<2x128xf32>
    %cst_49 = arith.constant 1.000000e+00 : f32
    %191 = vector.broadcast %cst_49 : f32 to vector<2x128xf32>
    %192 = arith.addf %191, %190 : vector<2x128xf32>
    %193 = arith.divf %191, %192 : vector<2x128xf32>
    %194 = vector.extract_strided_slice %187 {offsets = [0, 128], sizes = [2, 128], strides = [1, 1]} : vector<2x512xf32> to vector<2x128xf32>
    %195 = arith.negf %194 : vector<2x128xf32>
    %196 = math.exp %195 : vector<2x128xf32>
    %cst_50 = arith.constant 1.000000e+00 : f32
    %197 = vector.broadcast %cst_50 : f32 to vector<2x128xf32>
    %198 = arith.addf %197, %196 : vector<2x128xf32>
    %199 = arith.divf %197, %198 : vector<2x128xf32>
    %200 = vector.extract_strided_slice %187 {offsets = [0, 256], sizes = [2, 128], strides = [1, 1]} : vector<2x512xf32> to vector<2x128xf32>
    %201 = math.tanh %200 : vector<2x128xf32>
    %202 = vector.extract_strided_slice %187 {offsets = [0, 384], sizes = [2, 128], strides = [1, 1]} : vector<2x512xf32> to vector<2x128xf32>
    %203 = arith.negf %202 : vector<2x128xf32>
    %204 = math.exp %203 : vector<2x128xf32>
    %cst_51 = arith.constant 1.000000e+00 : f32
    %205 = vector.broadcast %cst_51 : f32 to vector<2x128xf32>
    %206 = arith.addf %205, %204 : vector<2x128xf32>
    %207 = arith.divf %205, %206 : vector<2x128xf32>
    %208 = arith.mulf %199, %180 : vector<2x128xf32>
    %209 = arith.mulf %193, %201 : vector<2x128xf32>
    %210 = arith.addf %208, %209 : vector<2x128xf32>
    %211 = math.tanh %210 : vector<2x128xf32>
    %212 = arith.mulf %207, %211 : vector<2x128xf32>
    %c0_52 = arith.constant 0 : index
    %c7 = arith.constant 7 : index
    %c0_53 = arith.constant 0 : index
    %c0_54 = arith.constant 0 : index
    %213 = vector.load %arg1[%c0_52, %c7, %c0_53, %c0_54] : memref<1x8x2x512xf32, #tpu.memory_space<vmem>>, vector<1x1x2x512xf32>
    %214 = vector.shape_cast %213 : vector<1x1x2x512xf32> to vector<2x512xf32>
    %215 = arith.truncf %212 : vector<2x128xf32> to vector<2x128xbf16>
    %cst_55 = arith.constant dense<0.000000e+00> : vector<2x512xf32>
    %216 = tpu.matmul %215, %4, %cst_55 {dimension_numbers = #tpu.dot_dimension_numbers<[1], [0], [0], [1], [0, 0, 1, 1], [], []>} : vector<2x128xbf16>, vector<128x512xbf16>, vector<2x512xf32> -> vector<2x512xf32>
    %217 = arith.addf %214, %216 : vector<2x512xf32>
    %218 = vector.extract_strided_slice %217 {offsets = [0, 0], sizes = [2, 128], strides = [1, 1]} : vector<2x512xf32> to vector<2x128xf32>
    %219 = arith.negf %218 : vector<2x128xf32>
    %220 = math.exp %219 : vector<2x128xf32>
    %cst_56 = arith.constant 1.000000e+00 : f32
    %221 = vector.broadcast %cst_56 : f32 to vector<2x128xf32>
    %222 = arith.addf %221, %220 : vector<2x128xf32>
    %223 = arith.divf %221, %222 : vector<2x128xf32>
    %224 = vector.extract_strided_slice %217 {offsets = [0, 128], sizes = [2, 128], strides = [1, 1]} : vector<2x512xf32> to vector<2x128xf32>
    %225 = arith.negf %224 : vector<2x128xf32>
    %226 = math.exp %225 : vector<2x128xf32>
    %cst_57 = arith.constant 1.000000e+00 : f32
    %227 = vector.broadcast %cst_57 : f32 to vector<2x128xf32>
    %228 = arith.addf %227, %226 : vector<2x128xf32>
    %229 = arith.divf %227, %228 : vector<2x128xf32>
    %230 = vector.extract_strided_slice %217 {offsets = [0, 256], sizes = [2, 128], strides = [1, 1]} : vector<2x512xf32> to vector<2x128xf32>
    %231 = math.tanh %230 : vector<2x128xf32>
    %232 = vector.extract_strided_slice %217 {offsets = [0, 384], sizes = [2, 128], strides = [1, 1]} : vector<2x512xf32> to vector<2x128xf32>
    %233 = arith.negf %232 : vector<2x128xf32>
    %234 = math.exp %233 : vector<2x128xf32>
    %cst_58 = arith.constant 1.000000e+00 : f32
    %235 = vector.broadcast %cst_58 : f32 to vector<2x128xf32>
    %236 = arith.addf %235, %234 : vector<2x128xf32>
    %237 = arith.divf %235, %236 : vector<2x128xf32>
    %238 = arith.mulf %229, %210 : vector<2x128xf32>
    %239 = arith.mulf %223, %231 : vector<2x128xf32>
    %240 = arith.addf %238, %239 : vector<2x128xf32>
    %241 = math.tanh %240 : vector<2x128xf32>
    %242 = arith.mulf %237, %241 : vector<2x128xf32>
    %c0_59 = arith.constant 0 : index
    %c0_60 = arith.constant 0 : index
    %243 = vector.load %arg8[%c0_59, %c0_60] : memref<2x128xf32, #tpu.memory_space<vmem>>, vector<2x128xf32>
    %244 = arith.truncf %242 : vector<2x128xf32> to vector<2x128xbf16>
    %c0_61 = arith.constant 0 : index
    %c0_62 = arith.constant 0 : index
    %c0_63 = arith.constant 0 : index
    %245 = vector.load %arg3[%c0_61, %c0_62, %c0_63] : memref<1x128x128xbf16, #tpu.memory_space<vmem>>, vector<1x128x128xbf16>
    %246 = vector.shape_cast %245 : vector<1x128x128xbf16> to vector<128x128xbf16>
    %cst_64 = arith.constant dense<0.000000e+00> : vector<2x128xf32>
    %247 = tpu.matmul %244, %246, %cst_64 {dimension_numbers = #tpu.dot_dimension_numbers<[1], [0], [0], [1], [0, 0, 1, 1], [], []>} : vector<2x128xbf16>, vector<128x128xbf16>, vector<2x128xf32> -> vector<2x128xf32>
    %248 = arith.addf %243, %247 : vector<2x128xf32>
    %c0_65 = arith.constant 0 : index
    %c0_66 = arith.constant 0 : index
    %249 = vector.load %arg8[%c0_65, %c0_66] : memref<2x128xf32, #tpu.memory_space<vmem>>, vector<2x128xf32>
    tpu.vector_store %arg8[%c0_65, %c0_66], %248 {strides = array<i32>} : memref<2x128xf32, #tpu.memory_space<vmem>>, vector<2x128xf32>,
    %c2_i32 = arith.constant 2 : i32
    %250 = arith.cmpi eq, %arg0, %c2_i32 : i32
    %251 = arith.extui %250 : i1 to i32
    %c0_i32_67 = arith.constant 0 : i32
    %252 = arith.cmpi ne, %251, %c0_i32_67 : i32
    scf.if %252 {
      %c0_68 = arith.constant 0 : index
      %c0_69 = arith.constant 0 : index
      %253 = vector.load %arg8[%c0_68, %c0_69] : memref<2x128xf32, #tpu.memory_space<vmem>>, vector<2x128xf32>
      %c0_70 = arith.constant 0 : index
      %c0_71 = arith.constant 0 : index
      %254 = vector.load %arg4[%c0_70, %c0_71] : memref<1x128xf32, #tpu.memory_space<vmem>>, vector<1x128xf32>
      %255 = vector.broadcast %254 : vector<1x128xf32> to vector<2x128xf32>
      %256 = arith.addf %253, %255 : vector<2x128xf32>
      %cst_72 = arith.constant 0.000000e+00 : f32
      %257 = vector.broadcast %cst_72 : f32 to vector<2x128xf32>
      %258 = arith.maximumf %256, %257 : vector<2x128xf32>
      %259 = arith.truncf %258 : vector<2x128xf32> to vector<2x128xbf16>
      %c0_73 = arith.constant 0 : index
      %c0_74 = arith.constant 0 : index
      %260 = vector.load %arg5[%c0_73, %c0_74] : memref<128x128xbf16, #tpu.memory_space<vmem>>, vector<128x128xbf16>
      %cst_75 = arith.constant dense<0.000000e+00> : vector<2x128xf32>
      %261 = tpu.matmul %259, %260, %cst_75 {dimension_numbers = #tpu.dot_dimension_numbers<[1], [0], [0], [1], [0, 0, 1, 1], [], []>} : vector<2x128xbf16>, vector<128x128xbf16>, vector<2x128xf32> -> vector<2x128xf32>
      %c0_76 = arith.constant 0 : index
      %c0_77 = arith.constant 0 : index
      %262 = vector.load %arg6[%c0_76, %c0_77] : memref<1x128xf32, #tpu.memory_space<vmem>>, vector<1x128xf32>
      %263 = vector.broadcast %262 : vector<1x128xf32> to vector<2x128xf32>
      %264 = arith.addf %261, %263 : vector<2x128xf32>
      %c0_78 = arith.constant 0 : index
      %c0_79 = arith.constant 0 : index
      %265 = vector.load %arg7[%c0_78, %c0_79] : memref<2x128xf32, #tpu.memory_space<vmem>>, vector<2x128xf32>
      tpu.vector_store %arg7[%c0_78, %c0_79], %264 {strides = array<i32>} : memref<2x128xf32, #tpu.memory_space<vmem>>, vector<2x128xf32>,
    } else {
    }
    return
  }
  func.func @transform_0(%arg0: i32) -> (i32, i32, i32, i32) {
    %c0_i32 = arith.constant 0 : i32
    %c0_i32_0 = arith.constant 0 : i32
    %c0_i32_1 = arith.constant 0 : i32
    %c0_i32_2 = arith.constant 0 : i32
    return %arg0, %c0_i32, %c0_i32_0, %c0_i32_1 : i32, i32, i32, i32
  }
  func.func @transform_1(%arg0: i32) -> (i32, i32, i32) {
    %c0_i32 = arith.constant 0 : i32
    %c0_i32_0 = arith.constant 0 : i32
    %c0_i32_1 = arith.constant 0 : i32
    return %arg0, %c0_i32, %c0_i32_0 : i32, i32, i32
  }
  func.func @transform_2(%arg0: i32) -> (i32, i32, i32) {
    %c0_i32 = arith.constant 0 : i32
    %c0_i32_0 = arith.constant 0 : i32
    %c0_i32_1 = arith.constant 0 : i32
    return %arg0, %c0_i32, %c0_i32_0 : i32, i32, i32
  }
  func.func @transform_3(%arg0: i32) -> (i32, i32) {
    %c0_i32 = arith.constant 0 : i32
    %c0_i32_0 = arith.constant 0 : i32
    %c0_i32_1 = arith.constant 0 : i32
    return %c0_i32, %c0_i32_0 : i32, i32
  }
  func.func @transform_4(%arg0: i32) -> (i32, i32) {
    %c0_i32 = arith.constant 0 : i32
    %c0_i32_0 = arith.constant 0 : i32
    %c0_i32_1 = arith.constant 0 : i32
    return %c0_i32, %c0_i32_0 : i32, i32
  }
  func.func @transform_5(%arg0: i32) -> (i32, i32) {
    %c0_i32 = arith.constant 0 : i32
    %c0_i32_0 = arith.constant 0 : i32
    %c0_i32_1 = arith.constant 0 : i32
    return %c0_i32, %c0_i32_0 : i32, i32
  }
  func.func @transform_6(%arg0: i32) -> (i32, i32) {
    %c0_i32 = arith.constant 0 : i32
    %c0_i32_0 = arith.constant 0 : i32
    %c0_i32_1 = arith.constant 0 : i32
    return %c0_i32, %c0_i32_0 : i32, i32
  }
}

</mosaic_0001>

<bundles_post_ra>
// kernel: dqn_forward.1
= control target key start
LH: loop header
LB: loop body
LE: loop exit
PB: predicated region body
PF: predicated region fallthrough
CT: control target
= control target key end

     0   :  { %11 = vsyncpa [#allocation4], 0  ;;  %s2259_s21 = smov 0   ;;  %s2738_s0 = inlined_call_operand.vmem [shape: f32[3,8,2,512], index: 0, kind: input, shape index: {}]   ;;  %s2739_s1 = inlined_call_operand.vmem [shape: bf16[3,128,512], index: 1, kind: input, shape index: {}]   ;;  %s2740_s2 = inlined_call_operand.vmem [shape: bf16[3,128,128], index: 2, kind: input, shape index: {}]   ;;  %s2741_s3 = inlined_call_operand.vmem [shape: f32[1,128], index: 3, kind: input, shape index: {}]   ;;  %s2742_s4 = inlined_call_operand.vmem [shape: bf16[128,128], index: 4, kind: input, shape index: {}]   ;;  %s2743_s5 = inlined_call_operand.vmem [shape: f32[1,128], index: 5, kind: input, shape index: {}]   ;;  %s2744_s6 = inlined_call_operand.hbm [shape: f32[2,128], index: 6, kind: output, shape index: {}]  }
   0x1 LB: > { %s2265_s22 = sadd.s32 4294967295, %s2214_s21   ;;  %p1789_p0 = scmp.ge.s32.totalorder %s2214_s21, 1  ;;  %s2214_s21 = sphi %s2259_s21, %s17_s21  }
   0x2   : > { %p228_p1 = scmp.lt.s32.totalorder %s2214_s21, 4 }
   0x4   : > { %p229_p2 = pnand %p1789_p0, %p228_p1 }
   0x5   : > { %p263_p3 = scmp.lt.s32.totalorder (!%p229_p2), %s2265_s22, 2  ;;  %p1796_p4 = scmp.ne.s32.totalorder (!%p229_p2), %s2265_s22, 0 }
   0x6   : > { %232 = sbr.rel (%p229_p2) target bundleno = 2422 (0x976), region = 44 }
   0xd   : > { %s264_s23 = scalar_select %p263_p3, %s2265_s22, 2 }
   0xe   : > { %282 = sbr.rel (%p1796_p4) target bundleno = 21 (0x15), region = 48  ;;  %v2216_v0 = vmov (!%p1796_p4), 0.0  }
   0xf   : > { %s1883_s24 = sshll.u32 %s264_s23, 6  ;;  %s1884_s25 = sshll.u32 %s264_s23, 8  ;;  %283 = vst [vmem:[#allocation2] sm:$0x3] (!%p1796_p4), %v2216_v0 }
  0x10   : > { %s2274_s28 = scalar_lea.vmem %s2738_s0, %s1883_s24  ;;  %s2279_s7 = scalar_lea.vmem %s2739_s1, %s1884_s25 }
  0x11   : > { %s2284_s10 = scalar_lea.vmem %s2740_s2, %s1883_s24 }
  0x15 PF: > { %v2288_v1 = vld [vmem:[%s2279_s7 + $0x4] ss:$16 sps:$4 sm:$0xff]   ;;  %v2291_v2 = vld [vmem:[%s2279_s7 + $0xc] ss:$16 sps:$4 sm:$0xff]   ;;  %v2217_v3 = vmov 0   ;;  %v602_v59 = vlaneseq  ;;  %vm2220_vm0 = vmmov 0  }
  0x16   : > { %543 = vmatprep.mubr.bf16.mxu0 %v2217_v3  ;;  %584 = vmatprep.mubr.bf16.mxu1 %v2217_v3  ;;  %v2297_v4 = vld [vmem:[%s2279_s7] ss:$16 sps:$4 sm:$0xff]   ;;  %v2300_v5 = vld [vmem:[%s2279_s7 + $0x8] ss:$16 sps:$4 sm:$0xff]   ;;  %v2304_v6 = vld [vmem:[%s2279_s7 + $0x24] ss:$16 sps:$4 sm:$0xff]  }
  0x17   : > { %511 = vmatprep.subr.bf16.mxu0 %v2288_v1  ;;  %552 = vmatprep.subr.bf16.mxu1 %v2291_v2  ;;  %v2309_v7 = vld [vmem:[%s2279_s7 + $0x2c] ss:$16 sps:$4 sm:$0xff]   ;;  %v2312_v8 = vld [vmem:[%s2279_s7 + $0x20] ss:$16 sps:$4 sm:$0xff]   ;;  %v2316_v9 = vld [vmem:[%s2279_s7 + $0x28] ss:$16 sps:$4 sm:$0xff]  }
  0x18   : > { %512 = vmatpush1.bf16.msra.mxu0 %v2297_v4  ;;  %553 = vmatpush1.bf16.msra.mxu1 %v2300_v5  ;;  %v2320_v10 = vld [vmem:[%s2279_s7 + $0x44] ss:$16 sps:$4 sm:$0xff]   ;;  %v2323_v11 = vld [vmem:[%s2279_s7 + $0x4c] ss:$16 sps:$4 sm:$0xff]   ;;  %v2326_v12 = vld [vmem:[%s2279_s7 + $0x40] ss:$16 sps:$4 sm:$0xff]  }
  0x19   : > { %513 = vmatprep.subr.bf16.mxu0 %v2304_v6  ;;  %554 = vmatprep.subr.bf16.mxu1 %v2309_v7  ;;  %v2329_v13 = vld [vmem:[%s2279_s7 + $0x48] ss:$16 sps:$4 sm:$0xff]   ;;  %v2334_v14 = vld [vmem:[%s2279_s7 + $0x64] ss:$16 sps:$4 sm:$0xff]   ;;  %v2339_v15 = vld [vmem:[%s2279_s7 + $0x6c] ss:$16 sps:$4 sm:$0xff]  }
  0x1a   : > { %v2342_v16 = vld [vmem:[%s2279_s7 + $0x60] ss:$16 sps:$4 sm:$0xff]   ;;  %v2347_v17 = vld [vmem:[%s2279_s7 + $0x68] ss:$16 sps:$4 sm:$0xff]   ;;  %v2350_v18 = vld [vmem:[%s2279_s7 + $0x84] ss:$16 sps:$4 sm:$0xff]  }
  0x1b   : > { %v2355_v19 = vld [vmem:[%s2279_s7 + $0x8c] ss:$16 sps:$4 sm:$0xff]   ;;  %v2358_v20 = vld [vmem:[%s2279_s7 + $0x80] ss:$16 sps:$4 sm:$0xff]   ;;  %v2361_v21 = vld [vmem:[%s2279_s7 + $0x88] ss:$16 sps:$4 sm:$0xff]  }
  0x1c   : > { %514 = vmatpush1.bf16.msra.mxu0 %v2312_v8  ;;  %555 = vmatpush1.bf16.msra.mxu1 %v2316_v9  ;;  %v2366_v22 = vld [vmem:[%s2279_s7 + $0xa4] ss:$16 sps:$4 sm:$0xff]   ;;  %v2371_v23 = vld [vmem:[%s2279_s7 + $0xac] ss:$16 sps:$4 sm:$0xff]   ;;  %v2374_v24 = vld [vmem:[%s2279_s7 + $0xa0] ss:$16 sps:$4 sm:$0xff]  }
  0x1d   : > { %515 = vmatprep.subr.bf16.mxu0 %v2320_v10  ;;  %556 = vmatprep.subr.bf16.mxu1 %v2323_v11  ;;  %v2379_v25 = vld [vmem:[%s2279_s7 + $0xa8] ss:$16 sps:$4 sm:$0xff]   ;;  %v2382_v26 = vld [vmem:[%s2279_s7 + $0xc4] ss:$16 sps:$4 sm:$0xff]   ;;  %v2387_v27 = vld [vmem:[%s2279_s7 + $0xcc] ss:$16 sps:$4 sm:$0xff]  }
  0x1e   : > { %v316_v28 = vld [vmem:[%s2274_s28] sm:$0xff]  ;;  %v2394_v30 = vld [vmem:[%s2279_s7 + $0xc8] ss:$16 sps:$4 sm:$0xff]   ;;  %v2400_v34 = vld [vmem:[%s2279_s7 + $0xec] ss:$16 sps:$4 sm:$0xff]   ;;  %v603_v61 = vshrl.u32 %v602_v59, 7 }
  0x1f   : > { %v2391_v29 = vld [vmem:[%s2279_s7 + $0xc0] ss:$16 sps:$4 sm:$0xff]   ;;  %v1797_v31 = vmul.f32 -1.442695, %v316_v28  ;;  %v324_v32 = vrot.slane %v316_v28, 2  ;;  %v335_v36 = vrot.slane %v316_v28, 6 }
  0x20   : > { %516 = vmatpush1.bf16.msra.mxu0 %v2326_v12  ;;  %557 = vmatpush1.bf16.msra.mxu1 %v2329_v13  ;;  %v2397_v33 = vld [vmem:[%s2279_s7 + $0xe4] ss:$16 sps:$4 sm:$0xff]   ;;  %v2407_v37 = vld [vmem:[%s2279_s7 + $0xe0] ss:$16 sps:$4 sm:$0xff]   ;;  %v2412_v38 = vld [vmem:[%s2279_s7 + $0xe8] ss:$16 sps:$4 sm:$0xff]  }
  0x21   : > { %517 = vmatprep.subr.bf16.mxu0 %v2334_v14  ;;  %558 = vmatprep.subr.bf16.mxu1 %v2339_v15  ;;  %2022 = vpow2.f32 %v1797_v31  ;;  %v1798_v35 = vmul.f32 -1.442695, %v324_v32  ;;  %v332_v39 = vrot.slane %v316_v28, 4  ;;  %v1799_v40 = vmul.f32 -1.442695, %v335_v36  ;;  %p1868_p5 = scmp.ne.s32.totalorder %s2265_s22, 2 }
  0x22   : > { %v2218_v57 = vmov 1983009808   ;;  %vm2222_vm1 = vmmov (!%p1868_p5), 0  }
  0x23   : > { %2024 = vpow2.f32 %v1798_v35  ;;  %v600_v58 = vunpack.c.l.s4 %v2218_v57 }
  0x24   : > { %518 = vmatpush1.bf16.msra.mxu0 %v2342_v16  ;;  %559 = vmatpush1.bf16.msra.mxu1 %v2347_v17  ;;  %2026 = vtanh.f32 %v332_v39 }
  0x25   : > { %519 = vmatprep.subr.bf16.mxu0 %v2350_v18  ;;  %560 = vmatprep.subr.bf16.mxu1 %v2355_v19  ;;  %2028 = vpow2.f32 %v1799_v40  ;;  %v601_v60 = vunpack.c.0.s8 %v600_v58 }
  0x27   : > { %v2457_v0 = vsub.s32 %v601_v60, %v603_v61 }
  0x28   : > { %520 = vmatpush1.bf16.msra.mxu0 %v2358_v20  ;;  %561 = vmatpush1.bf16.msra.mxu1 %v2361_v21 }
  0x29   : > { %521 = vmatprep.subr.bf16.mxu0 %v2366_v22  ;;  %562 = vmatprep.subr.bf16.mxu1 %v2371_v23 }
  0x2b   : > { %v2023_v41 = vpop.eup %2022 }
  0x2c   : > { %522 = vmatpush1.bf16.msra.mxu0 %v2374_v24  ;;  %563 = vmatpush1.bf16.msra.mxu1 %v2379_v25  ;;  %v320_v42 = vadd.f32 1.0, %v2023_v41 }
  0x2d   : > { %523 = vmatprep.subr.bf16.mxu0 %v2382_v26  ;;  %564 = vmatprep.subr.bf16.mxu1 %v2387_v27  ;;  %v2025_v43 = vpop.eup %2024 }
  0x2e   : > { %2030 = vrcp.f32 %v320_v42  ;;  %v329_v44 = vadd.f32 1.0, %v2025_v43  ;;  %v2027_v45 = vpop.eup %2026 }
  0x2f   : > { %v2029_v46 = vpop.eup %2028 }
  0x30   : > { %524 = vmatpush1.bf16.msra.mxu0 %v2391_v29  ;;  %565 = vmatpush1.bf16.msra.mxu1 %v2394_v30  ;;  %2032 = vrcp.f32 %v329_v44  ;;  %v340_v48 = vadd.f32 1.0, %v2029_v46  ;;  %v1800_v44 = vld [vmem:[%s2274_s28 + $0x8] sm:$0xff] }
  0x31   : > { %525 = vmatprep.subr.bf16.mxu0 %v2397_v33  ;;  %566 = vmatprep.subr.bf16.mxu1 %v2400_v34 }
  0x32   : > { %2034 = vrcp.f32 %v340_v48 }
  0x34   : > { %526 = vmatpush1.bf16.msra.mxu0 %v2407_v37  ;;  %567 = vmatpush1.bf16.msra.mxu1 %v2412_v38 }
  0x35   : > { %650 = vmatprep.subr.bf16.mxu0 %v2288_v1  ;;  %691 = vmatprep.subr.bf16.mxu1 %v2291_v2 }
  0x38   : > { %v2031_v47 = vpop.eup %2030 }
  0x39   : > { %v344_v49 = vmul.f32 %v2031_v47, %v2027_v45 }
  0x3a   : > { %v2033_v50 = vpop.eup %2032 }
  0x3b   : > { %v343_v51 = vmul.f32 0.0, %v2033_v50 }
  0x3c   : > { %v2035_v53 = vpop.eup %2034 }
  0x3d   : > { %v2420_v52 = vadd.f32 %v344_v49, %v343_v51 }
  0x3f   : > { %2036 = vtanh.f32 %v2420_v52 }
  0x49   : > { %v2037_v54 = vpop.eup %2036 }
  0x4a   : > { %v347_v55 = vmul.f32 %v2037_v54, %v2035_v53 }
  0x4c   : > { %v350_v56 = vpack.c.bf16 %v347_v55, %v347_v55 }
  0x4e   : > { %544 = vmatmul.mubr.bf16.vlgmr.msra.gmra.mrb[0].mxu0 %v350_v56  ;;  %585 = vmatmul.mubr.bf16.vlgmr.msra.gmra.mrb[0].mxu1 %v350_v56 }
  0x4f   : > { %651 = vmatpush1.bf16.msra.mxu0 %v2297_v4  ;;  %692 = vmatpush1.bf16.msra.mxu1 %v2300_v5 }
  0x50   : > { %652 = vmatprep.subr.bf16.mxu0 %v2304_v6  ;;  %693 = vmatprep.subr.bf16.mxu1 %v2309_v7 }
  0x51   : > { %682 = vmatprep.mubr.bf16.mxu0 %v2217_v3  ;;  %723 = vmatprep.mubr.bf16.mxu1 %v2217_v3 }
  0x53   : > { %653 = vmatpush1.bf16.msra.mxu0 %v2312_v8  ;;  %694 = vmatpush1.bf16.msra.mxu1 %v2316_v9 }
  0x54   : > { %654 = vmatprep.subr.bf16.mxu0 %v2320_v10  ;;  %695 = vmatprep.subr.bf16.mxu1 %v2323_v11 }
  0x57   : > { %655 = vmatpush1.bf16.msra.mxu0 %v2326_v12  ;;  %696 = vmatpush1.bf16.msra.mxu1 %v2329_v13 }
  0x58   : > { %656 = vmatprep.subr.bf16.mxu0 %v2334_v14  ;;  %697 = vmatprep.subr.bf16.mxu1 %v2339_v15 }
  0x5b   : > { %657 = vmatpush1.bf16.msra.mxu0 %v2342_v16  ;;  %698 = vmatpush1.bf16.msra.mxu1 %v2347_v17 }
  0x5c   : > { %658 = vmatprep.subr.bf16.mxu0 %v2350_v18  ;;  %699 = vmatprep.subr.bf16.mxu1 %v2355_v19 }
  0x5f   : > { %659 = vmatpush1.bf16.msra.mxu0 %v2358_v20  ;;  %700 = vmatpush1.bf16.msra.mxu1 %v2361_v21 }
  0x60   : > { %660 = vmatprep.subr.bf16.mxu0 %v2366_v22  ;;  %701 = vmatprep.subr.bf16.mxu1 %v2371_v23 }
  0x63   : > { %661 = vmatpush1.bf16.msra.mxu0 %v2374_v24  ;;  %702 = vmatpush1.bf16.msra.mxu1 %v2379_v25 }
  0x64   : > { %662 = vmatprep.subr.bf16.mxu0 %v2382_v26  ;;  %703 = vmatprep.subr.bf16.mxu1 %v2387_v27 }
  0x67   : > { %663 = vmatpush1.bf16.msra.mxu0 %v2391_v29  ;;  %704 = vmatpush1.bf16.msra.mxu1 %v2394_v30 }
  0x68   : > { %664 = vmatprep.subr.bf16.mxu0 %v2397_v33  ;;  %705 = vmatprep.subr.bf16.mxu1 %v2400_v34 }
  0x6b   : > { %665 = vmatpush1.bf16.msra.mxu0 %v2407_v37  ;;  %706 = vmatpush1.bf16.msra.mxu1 %v2412_v38 }
  0x6c   : > { %789 = vmatprep.subr.bf16.mxu0 %v2288_v1  ;;  %830 = vmatprep.subr.bf16.mxu1 %v2291_v2 }
 0x121   : > { %v545_v62 = vpop.f32.mrb[0].mxu0  ;;  %v586_v63 = vpop.f32.mrb[0].mxu1 }
 0x122   : > { %v547_v28 = vpop.f32.mrb[1].mxu0  ;;  %v588_v31 = vpop.f32.mrb[1].mxu1 }
 0x123   : > { %v597_v32 = vcombine.low %v545_v62, %v547_v28  ;;  %v598_v35 = vcombine.low %v586_v63, %v588_v31  ;;  %v549_v36 = vpop.f32.mrb[2].mxu0  ;;  %v590_v39 = vpop.f32.mrb[2].mxu1 }
 0x124   : > { %v550_v40 = vpop.f32.mrb[3].mxu0  ;;  %v591_v41 = vpop.f32.mrb[3].mxu1 }
 0x125   : > { %v605_v42 = vrot.slane %v597_v32, %v2457_v0  ;;  %v612_v43 = vrot.slane %v598_v35, %v2457_v0 }
 0x127   : > { %v613_v45 = vcombine.low %v605_v42, %v612_v43 }
 0x129   : > { %v615_v46 = vadd.f32 %v1800_v44, %v613_v45 }
 0x12b   : > { %v1833_v47 = vmul.f32 -1.442695, %v615_v46  ;;  %v623_v48 = vrot.slane %v615_v46, 2  ;;  %v634_v50 = vrot.slane %v615_v46, 6  ;;  %v631_v54 = vrot.slane %v615_v46, 4 }
 0x12d   : > { %2038 = vpow2.f32 %v1833_v47  ;;  %v1834_v49 = vmul.f32 -1.442695, %v623_v48  ;;  %v1835_v51 = vmul.f32 -1.442695, %v634_v50 }
 0x12f   : > { %2040 = vpow2.f32 %v1834_v49 }
 0x130   : > { %2042 = vpow2.f32 %v1835_v51  ;;  %v1836_v51 = vld [vmem:[%s2274_s28 + $0x10] sm:$0xff] }
 0x137   : > { %v2039_v53 = vpop.eup %2038 }
 0x138   : > { %v619_v55 = vadd.f32 1.0, %v2039_v53 }
 0x139   : > { %v2041_v56 = vpop.eup %2040 }
 0x13a   : > { %2044 = vrcp.f32 %v619_v55  ;;  %v628_v57 = vadd.f32 1.0, %v2041_v56  ;;  %v2043_v58 = vpop.eup %2042 }
 0x13b   : > { %2046 = vtanh.f32 %v631_v54  ;;  %v639_v62 = vadd.f32 1.0, %v2043_v58 }
 0x13c   : > { %2048 = vrcp.f32 %v628_v57 }
 0x13d   : > { %2050 = vrcp.f32 %v639_v62 }
 0x144   : > { %v2045_v59 = vpop.eup %2044 }
 0x145   : > { %v2047_v60 = vpop.eup %2046 }
 0x146   : > { %v2049_v61 = vpop.eup %2048  ;;  %v643_v28 = vmul.f32 %v2047_v60, %v2045_v59 }
 0x147   : > { %v642_v63 = vmul.f32 %v2049_v61, %v2420_v52  ;;  %v2051_v32 = vpop.eup %2050 }
 0x149   : > { %v2463_v31 = vadd.f32 %v643_v28, %v642_v63 }
 0x14b   : > { %2052 = vtanh.f32 %v2463_v31 }
 0x155   : > { %v2053_v35 = vpop.eup %2052 }
 0x156   : > { %v646_v36 = vmul.f32 %v2053_v35, %v2051_v32 }
 0x158   : > { %v649_v39 = vpack.c.bf16 %v646_v36, %v646_v36 }
 0x15a   : > { %683 = vmatmul.mubr.bf16.vlgmr.msra.gmra.mrb[4].mxu0 %v649_v39  ;;  %724 = vmatmul.mubr.bf16.vlgmr.msra.gmra.mrb[4].mxu1 %v649_v39 }
 0x15b   : > { %790 = vmatpush1.bf16.msra.mxu0 %v2297_v4  ;;  %831 = vmatpush1.bf16.msra.mxu1 %v2300_v5 }
 0x15c   : > { %791 = vmatprep.subr.bf16.mxu0 %v2304_v6  ;;  %832 = vmatprep.subr.bf16.mxu1 %v2309_v7 }
 0x15d   : > { %821 = vmatprep.mubr.bf16.mxu0 %v2217_v3  ;;  %862 = vmatprep.mubr.bf16.mxu1 %v2217_v3 }
 0x15f   : > { %792 = vmatpush1.bf16.msra.mxu0 %v2312_v8  ;;  %833 = vmatpush1.bf16.msra.mxu1 %v2316_v9 }
 0x160   : > { %793 = vmatprep.subr.bf16.mxu0 %v2320_v10  ;;  %834 = vmatprep.subr.bf16.mxu1 %v2323_v11 }
 0x163   : > { %794 = vmatpush1.bf16.msra.mxu0 %v2326_v12  ;;  %835 = vmatpush1.bf16.msra.mxu1 %v2329_v13 }
 0x164   : > { %795 = vmatprep.subr.bf16.mxu0 %v2334_v14  ;;  %836 = vmatprep.subr.bf16.mxu1 %v2339_v15 }
 0x167   : > { %796 = vmatpush1.bf16.msra.mxu0 %v2342_v16  ;;  %837 = vmatpush1.bf16.msra.mxu1 %v2347_v17 }
 0x168   : > { %797 = vmatprep.subr.bf16.mxu0 %v2350_v18  ;;  %838 = vmatprep.subr.bf16.mxu1 %v2355_v19 }
 0x16b   : > { %798 = vmatpush1.bf16.msra.mxu0 %v2358_v20  ;;  %839 = vmatpush1.bf16.msra.mxu1 %v2361_v21 }
 0x16c   : > { %799 = vmatprep.subr.bf16.mxu0 %v2366_v22  ;;  %840 = vmatprep.subr.bf16.mxu1 %v2371_v23 }
 0x16f   : > { %800 = vmatpush1.bf16.msra.mxu0 %v2374_v24  ;;  %841 = vmatpush1.bf16.msra.mxu1 %v2379_v25 }
 0x170   : > { %801 = vmatprep.subr.bf16.mxu0 %v2382_v26  ;;  %842 = vmatprep.subr.bf16.mxu1 %v2387_v27 }
 0x173   : > { %802 = vmatpush1.bf16.msra.mxu0 %v2391_v29  ;;  %843 = vmatpush1.bf16.msra.mxu1 %v2394_v30 }
 0x174   : > { %803 = vmatprep.subr.bf16.mxu0 %v2397_v33  ;;  %844 = vmatprep.subr.bf16.mxu1 %v2400_v34 }
 0x177   : > { %804 = vmatpush1.bf16.msra.mxu0 %v2407_v37  ;;  %845 = vmatpush1.bf16.msra.mxu1 %v2412_v38 }
 0x178   : > { %928 = vmatprep.subr.bf16.mxu0 %v2288_v1  ;;  %969 = vmatprep.subr.bf16.mxu1 %v2291_v2 }
 0x22d   : > { %v684_v52 = vpop.f32.mrb[4].mxu0  ;;  %v725_v40 = vpop.f32.mrb[4].mxu1 }
 0x22e   : > { %v686_v41 = vpop.f32.mrb[5].mxu0  ;;  %v727_v42 = vpop.f32.mrb[5].mxu1 }
 0x22f   : > { %v736_v43 = vcombine.low %v684_v52, %v686_v41  ;;  %v737_v44 = vcombine.low %v725_v40, %v727_v42  ;;  %v688_v45 = vpop.f32.mrb[6].mxu0  ;;  %v729_v46 = vpop.f32.mrb[6].mxu1 }
 0x230   : > { %v689_v47 = vpop.f32.mrb[7].mxu0  ;;  %v730_v48 = vpop.f32.mrb[7].mxu1 }
 0x231   : > { %v744_v49 = vrot.slane %v736_v43, %v2457_v0  ;;  %v751_v50 = vrot.slane %v737_v44, %v2457_v0 }
 0x233   : > { %v752_v53 = vcombine.low %v744_v49, %v751_v50 }
 0x235   : > { %v754_v54 = vadd.f32 %v1836_v51, %v752_v53 }
 0x237   : > { %v1837_v55 = vmul.f32 -1.442695, %v754_v54  ;;  %v762_v56 = vrot.slane %v754_v54, 2  ;;  %v773_v58 = vrot.slane %v754_v54, 6  ;;  %v770_v61 = vrot.slane %v754_v54, 4 }
 0x239   : > { %2054 = vpow2.f32 %v1837_v55  ;;  %v1838_v57 = vmul.f32 -1.442695, %v762_v56  ;;  %v1839_v59 = vmul.f32 -1.442695, %v773_v58 }
 0x23b   : > { %2056 = vpow2.f32 %v1838_v57 }
 0x23c   : > { %2058 = vpow2.f32 %v1839_v59  ;;  %v1840_v59 = vld [vmem:[%s2274_s28 + $0x18] sm:$0xff] }
 0x243   : > { %v2055_v60 = vpop.eup %2054 }
 0x244   : > { %v758_v62 = vadd.f32 1.0, %v2055_v60 }
 0x245   : > { %v2057_v63 = vpop.eup %2056 }
 0x246   : > { %2060 = vrcp.f32 %v758_v62  ;;  %v767_v28 = vadd.f32 1.0, %v2057_v63  ;;  %v2059_v32 = vpop.eup %2058 }
 0x247   : > { %2062 = vtanh.f32 %v770_v61  ;;  %v778_v52 = vadd.f32 1.0, %v2059_v32 }
 0x248   : > { %2064 = vrcp.f32 %v767_v28 }
 0x249   : > { %2066 = vrcp.f32 %v778_v52 }
 0x250   : > { %v2061_v35 = vpop.eup %2060 }
 0x251   : > { %v2063_v36 = vpop.eup %2062 }
 0x252   : > { %v2065_v39 = vpop.eup %2064  ;;  %v782_v41 = vmul.f32 %v2063_v36, %v2061_v35 }
 0x253   : > { %v781_v40 = vmul.f32 %v2065_v39, %v2463_v31  ;;  %v2067_v43 = vpop.eup %2066 }
 0x255   : > { %v2504_v42 = vadd.f32 %v782_v41, %v781_v40 }
 0x257   : > { %2068 = vtanh.f32 %v2504_v42 }
 0x261   : > { %v2069_v44 = vpop.eup %2068 }
 0x262   : > { %v785_v45 = vmul.f32 %v2069_v44, %v2067_v43 }
 0x264   : > { %v788_v46 = vpack.c.bf16 %v785_v45, %v785_v45 }
 0x266   : > { %822 = vmatmul.mubr.bf16.vlgmr.msra.gmra.mrb[8].mxu0 %v788_v46  ;;  %863 = vmatmul.mubr.bf16.vlgmr.msra.gmra.mrb[8].mxu1 %v788_v46 }
 0x267   : > { %929 = vmatpush1.bf16.msra.mxu0 %v2297_v4  ;;  %970 = vmatpush1.bf16.msra.mxu1 %v2300_v5 }
 0x268   : > { %930 = vmatprep.subr.bf16.mxu0 %v2304_v6  ;;  %971 = vmatprep.subr.bf16.mxu1 %v2309_v7 }
 0x269   : > { %960 = vmatprep.mubr.bf16.mxu0 %v2217_v3  ;;  %1001 = vmatprep.mubr.bf16.mxu1 %v2217_v3 }
 0x26b   : > { %931 = vmatpush1.bf16.msra.mxu0 %v2312_v8  ;;  %972 = vmatpush1.bf16.msra.mxu1 %v2316_v9 }
 0x26c   : > { %932 = vmatprep.subr.bf16.mxu0 %v2320_v10  ;;  %973 = vmatprep.subr.bf16.mxu1 %v2323_v11 }
 0x26f   : > { %933 = vmatpush1.bf16.msra.mxu0 %v2326_v12  ;;  %974 = vmatpush1.bf16.msra.mxu1 %v2329_v13 }
 0x270   : > { %934 = vmatprep.subr.bf16.mxu0 %v2334_v14  ;;  %975 = vmatprep.subr.bf16.mxu1 %v2339_v15 }
 0x273   : > { %935 = vmatpush1.bf16.msra.mxu0 %v2342_v16  ;;  %976 = vmatpush1.bf16.msra.mxu1 %v2347_v17 }
 0x274   : > { %936 = vmatprep.subr.bf16.mxu0 %v2350_v18  ;;  %977 = vmatprep.subr.bf16.mxu1 %v2355_v19 }
 0x277   : > { %937 = vmatpush1.bf16.msra.mxu0 %v2358_v20  ;;  %978 = vmatpush1.bf16.msra.mxu1 %v2361_v21 }
 0x278   : > { %938 = vmatprep.subr.bf16.mxu0 %v2366_v22  ;;  %979 = vmatprep.subr.bf16.mxu1 %v2371_v23 }
 0x27b   : > { %939 = vmatpush1.bf16.msra.mxu0 %v2374_v24  ;;  %980 = vmatpush1.bf16.msra.mxu1 %v2379_v25 }
 0x27c   : > { %940 = vmatprep.subr.bf16.mxu0 %v2382_v26  ;;  %981 = vmatprep.subr.bf16.mxu1 %v2387_v27 }
 0x27f   : > { %941 = vmatpush1.bf16.msra.mxu0 %v2391_v29  ;;  %982 = vmatpush1.bf16.msra.mxu1 %v2394_v30 }
 0x280   : > { %942 = vmatprep.subr.bf16.mxu0 %v2397_v33  ;;  %983 = vmatprep.subr.bf16.mxu1 %v2400_v34 }
 0x283   : > { %943 = vmatpush1.bf16.msra.mxu0 %v2407_v37  ;;  %984 = vmatpush1.bf16.msra.mxu1 %v2412_v38 }
 0x284   : > { %1067 = vmatprep.subr.bf16.mxu0 %v2288_v1  ;;  %1108 = vmatprep.subr.bf16.mxu1 %v2291_v2 }
 0x339   : > { %v823_v31 = vpop.f32.mrb[8].mxu0  ;;  %v864_v47 = vpop.f32.mrb[8].mxu1 }
 0x33a   : > { %v825_v48 = vpop.f32.mrb[9].mxu0  ;;  %v866_v49 = vpop.f32.mrb[9].mxu1 }
 0x33b   : > { %v875_v50 = vcombine.low %v823_v31, %v825_v48  ;;  %v876_v51 = vcombine.low %v864_v47, %v866_v49  ;;  %v827_v53 = vpop.f32.mrb[10].mxu0  ;;  %v868_v54 = vpop.f32.mrb[10].mxu1 }
 0x33c   : > { %v828_v55 = vpop.f32.mrb[11].mxu0  ;;  %v869_v56 = vpop.f32.mrb[11].mxu1 }
 0x33d   : > { %v883_v57 = vrot.slane %v875_v50, %v2457_v0  ;;  %v890_v58 = vrot.slane %v876_v51, %v2457_v0 }
 0x33f   : > { %v891_v60 = vcombine.low %v883_v57, %v890_v58 }
 0x341   : > { %v893_v61 = vadd.f32 %v1840_v59, %v891_v60 }
 0x343   : > { %v1841_v62 = vmul.f32 -1.442695, %v893_v61  ;;  %v901_v63 = vrot.slane %v893_v61, 2  ;;  %v912_v32 = vrot.slane %v893_v61, 6  ;;  %v909_v39 = vrot.slane %v893_v61, 4 }
 0x345   : > { %2070 = vpow2.f32 %v1841_v62  ;;  %v1842_v28 = vmul.f32 -1.442695, %v901_v63  ;;  %v1843_v35 = vmul.f32 -1.442695, %v912_v32 }
 0x347   : > { %2072 = vpow2.f32 %v1842_v28 }
 0x348   : > { %2074 = vpow2.f32 %v1843_v35  ;;  %v1844_v35 = vld [vmem:[%s2274_s28 + $0x20] sm:$0xff] }
 0x34f   : > { %v2071_v36 = vpop.eup %2070 }
 0x350   : > { %v897_v52 = vadd.f32 1.0, %v2071_v36 }
 0x351   : > { %v2073_v40 = vpop.eup %2072 }
 0x352   : > { %2076 = vrcp.f32 %v897_v52  ;;  %v906_v41 = vadd.f32 1.0, %v2073_v40  ;;  %v2075_v43 = vpop.eup %2074 }
 0x353   : > { %2078 = vtanh.f32 %v909_v39  ;;  %v917_v31 = vadd.f32 1.0, %v2075_v43 }
 0x354   : > { %2080 = vrcp.f32 %v906_v41 }
 0x355   : > { %2082 = vrcp.f32 %v917_v31 }
 0x35c   : > { %v2077_v44 = vpop.eup %2076 }
 0x35d   : > { %v2079_v45 = vpop.eup %2078 }
 0x35e   : > { %v2081_v46 = vpop.eup %2080  ;;  %v921_v48 = vmul.f32 %v2079_v45, %v2077_v44 }
 0x35f   : > { %v920_v47 = vmul.f32 %v2081_v46, %v2504_v42  ;;  %v2083_v50 = vpop.eup %2082 }
 0x361   : > { %v2545_v49 = vadd.f32 %v921_v48, %v920_v47 }
 0x363   : > { %2084 = vtanh.f32 %v2545_v49 }
 0x36d   : > { %v2085_v51 = vpop.eup %2084 }
 0x36e   : > { %v924_v53 = vmul.f32 %v2085_v51, %v2083_v50 }
 0x370   : > { %v927_v54 = vpack.c.bf16 %v924_v53, %v924_v53 }
 0x372   : > { %961 = vmatmul.mubr.bf16.vlgmr.msra.gmra.mrb[12].mxu0 %v927_v54  ;;  %1002 = vmatmul.mubr.bf16.vlgmr.msra.gmra.mrb[12].mxu1 %v927_v54 }
 0x373   : > { %1068 = vmatpush1.bf16.msra.mxu0 %v2297_v4  ;;  %1109 = vmatpush1.bf16.msra.mxu1 %v2300_v5 }
 0x374   : > { %1069 = vmatprep.subr.bf16.mxu0 %v2304_v6  ;;  %1110 = vmatprep.subr.bf16.mxu1 %v2309_v7 }
 0x375   : > { %1099 = vmatprep.mubr.bf16.mxu0 %v2217_v3  ;;  %1140 = vmatprep.mubr.bf16.mxu1 %v2217_v3 }
 0x377   : > { %1070 = vmatpush1.bf16.msra.mxu0 %v2312_v8  ;;  %1111 = vmatpush1.bf16.msra.mxu1 %v2316_v9 }
 0x378   : > { %1071 = vmatprep.subr.bf16.mxu0 %v2320_v10  ;;  %1112 = vmatprep.subr.bf16.mxu1 %v2323_v11 }
 0x37b   : > { %1072 = vmatpush1.bf16.msra.mxu0 %v2326_v12  ;;  %1113 = vmatpush1.bf16.msra.mxu1 %v2329_v13 }
 0x37c   : > { %1073 = vmatprep.subr.bf16.mxu0 %v2334_v14  ;;  %1114 = vmatprep.subr.bf16.mxu1 %v2339_v15 }
 0x37f   : > { %1074 = vmatpush1.bf16.msra.mxu0 %v2342_v16  ;;  %1115 = vmatpush1.bf16.msra.mxu1 %v2347_v17 }
 0x380   : > { %1075 = vmatprep.subr.bf16.mxu0 %v2350_v18  ;;  %1116 = vmatprep.subr.bf16.mxu1 %v2355_v19 }
 0x383   : > { %1076 = vmatpush1.bf16.msra.mxu0 %v2358_v20  ;;  %1117 = vmatpush1.bf16.msra.mxu1 %v2361_v21 }
 0x384   : > { %1077 = vmatprep.subr.bf16.mxu0 %v2366_v22  ;;  %1118 = vmatprep.subr.bf16.mxu1 %v2371_v23 }
 0x387   : > { %1078 = vmatpush1.bf16.msra.mxu0 %v2374_v24  ;;  %1119 = vmatpush1.bf16.msra.mxu1 %v2379_v25 }
 0x388   : > { %1079 = vmatprep.subr.bf16.mxu0 %v2382_v26  ;;  %1120 = vmatprep.subr.bf16.mxu1 %v2387_v27 }
 0x38b   : > { %1080 = vmatpush1.bf16.msra.mxu0 %v2391_v29  ;;  %1121 = vmatpush1.bf16.msra.mxu1 %v2394_v30 }
 0x38c   : > { %1081 = vmatprep.subr.bf16.mxu0 %v2397_v33  ;;  %1122 = vmatprep.subr.bf16.mxu1 %v2400_v34 }
 0x38f   : > { %1082 = vmatpush1.bf16.msra.mxu0 %v2407_v37  ;;  %1123 = vmatpush1.bf16.msra.mxu1 %v2412_v38 }
 0x390   : > { %1206 = vmatprep.subr.bf16.mxu0 %v2288_v1  ;;  %1247 = vmatprep.subr.bf16.mxu1 %v2291_v2 }
 0x445   : > { %v962_v42 = vpop.f32.mrb[12].mxu0  ;;  %v1003_v55 = vpop.f32.mrb[12].mxu1 }
 0x446   : > { %v964_v56 = vpop.f32.mrb[13].mxu0  ;;  %v1005_v57 = vpop.f32.mrb[13].mxu1 }
 0x447   : > { %v1014_v58 = vcombine.low %v962_v42, %v964_v56  ;;  %v1015_v59 = vcombine.low %v1003_v55, %v1005_v57  ;;  %v966_v60 = vpop.f32.mrb[14].mxu0  ;;  %v1007_v61 = vpop.f32.mrb[14].mxu1 }
 0x448   : > { %v967_v62 = vpop.f32.mrb[15].mxu0  ;;  %v1008_v63 = vpop.f32.mrb[15].mxu1 }
 0x449   : > { %v1022_v28 = vrot.slane %v1014_v58, %v2457_v0  ;;  %v1029_v32 = vrot.slane %v1015_v59, %v2457_v0 }
 0x44b   : > { %v1030_v36 = vcombine.low %v1022_v28, %v1029_v32 }
 0x44d   : > { %v1032_v39 = vadd.f32 %v1844_v35, %v1030_v36 }
 0x44f   : > { %v1845_v52 = vmul.f32 -1.442695, %v1032_v39  ;;  %v1040_v40 = vrot.slane %v1032_v39, 2  ;;  %v1051_v43 = vrot.slane %v1032_v39, 6  ;;  %v1048_v46 = vrot.slane %v1032_v39, 4 }
 0x451   : > { %2086 = vpow2.f32 %v1845_v52  ;;  %v1846_v41 = vmul.f32 -1.442695, %v1040_v40  ;;  %v1847_v44 = vmul.f32 -1.442695, %v1051_v43 }
 0x453   : > { %2088 = vpow2.f32 %v1846_v41 }
 0x454   : > { %2090 = vpow2.f32 %v1847_v44 }
 0x45b   : > { %v2087_v45 = vpop.eup %2086 }
 0x45c   : > { %v1036_v31 = vadd.f32 1.0, %v2087_v45 }
 0x45d   : > { %v2089_v47 = vpop.eup %2088 }
 0x45e   : > { %2092 = vrcp.f32 %v1036_v31  ;;  %v1045_v48 = vadd.f32 1.0, %v2089_v47  ;;  %v2091_v50 = vpop.eup %2090  ;;  %v2150_v31 = vld [vmem:[%s2279_s7] ss:$16 sps:$4 sm:$0xff]   ;;  %v2151_v47 = vld [vmem:[%s2279_s7 + $0x8] ss:$16 sps:$4 sm:$0xff]  }
 0x45f   : > { %2094 = vtanh.f32 %v1048_v46  ;;  %v1056_v42 = vadd.f32 1.0, %v2091_v50  ;;  %v2153_v50 = vld [vmem:[%s2279_s7 + $0x2c] ss:$16 sps:$4 sm:$0xff]  }
 0x460   : > { %2096 = vrcp.f32 %v1045_v48  ;;  %v2152_v48 = vld [vmem:[%s2279_s7 + $0x24] ss:$16 sps:$4 sm:$0xff]  }
 0x461   : > { %2098 = vrcp.f32 %v1056_v42  ;;  %v2157_v42 = vld [vmem:[%s2279_s7 + $0x4c] ss:$16 sps:$4 sm:$0xff]  }
 0x468   : > { %v2093_v51 = vpop.eup %2092 }
 0x469   : > { %v2095_v53 = vpop.eup %2094 }
 0x46a   : > { %v2097_v54 = vpop.eup %2096  ;;  %v1060_v56 = vmul.f32 %v2095_v53, %v2093_v51  ;;  %v2154_v51 = vld [vmem:[%s2279_s7 + $0x20] ss:$16 sps:$4 sm:$0xff]   ;;  %v2155_v53 = vld [vmem:[%s2279_s7 + $0x28] ss:$16 sps:$4 sm:$0xff]  }
 0x46b   : > { %v1059_v55 = vmul.f32 %v2097_v54, %v2545_v49  ;;  %v2099_v58 = vpop.eup %2098  ;;  %v2156_v54 = vld [vmem:[%s2279_s7 + $0x44] ss:$16 sps:$4 sm:$0xff]  }
 0x46d   : > { %v2586_v57 = vadd.f32 %v1060_v56, %v1059_v55  ;;  %v2158_v55 = vld [vmem:[%s2279_s7 + $0x40] ss:$16 sps:$4 sm:$0xff]   ;;  %v2159_v56 = vld [vmem:[%s2279_s7 + $0x48] ss:$16 sps:$4 sm:$0xff]  }
 0x46f   : > { %2100 = vtanh.f32 %v2586_v57 }
 0x479   : > { %v2101_v59 = vpop.eup %2100 }
 0x47a   : > { %v1063_v60 = vmul.f32 %v2101_v59, %v2099_v58  ;;  %v2162_v58 = vld [vmem:[%s2279_s7 + $0x60] ss:$16 sps:$4 sm:$0xff]   ;;  %v2163_v59 = vld [vmem:[%s2279_s7 + $0x68] ss:$16 sps:$4 sm:$0xff]  }
 0x47c   : > { %v1066_v61 = vpack.c.bf16 %v1063_v60, %v1063_v60  ;;  %v2164_v60 = vld [vmem:[%s2279_s7 + $0x84] ss:$16 sps:$4 sm:$0xff]  }
 0x47e   : > { %1100 = vmatmul.mubr.bf16.vlgmr.msra.gmra.mrb[16].mxu0 %v1066_v61  ;;  %1141 = vmatmul.mubr.bf16.vlgmr.msra.gmra.mrb[16].mxu1 %v1066_v61  ;;  %v2165_v61 = vld [vmem:[%s2279_s7 + $0x8c] ss:$16 sps:$4 sm:$0xff]  }
 0x47f   : > { %1207 = vmatpush1.bf16.msra.mxu0 %v2297_v4  ;;  %1248 = vmatpush1.bf16.msra.mxu1 %v2300_v5 }
 0x480   : > { %1208 = vmatprep.subr.bf16.mxu0 %v2304_v6  ;;  %1249 = vmatprep.subr.bf16.mxu1 %v2309_v7 }
 0x481   : > { %1238 = vmatprep.mubr.bf16.mxu0 %v2217_v3  ;;  %1279 = vmatprep.mubr.bf16.mxu1 %v2217_v3 }
 0x483   : > { %1209 = vmatpush1.bf16.msra.mxu0 %v2312_v8  ;;  %1250 = vmatpush1.bf16.msra.mxu1 %v2316_v9 }
 0x484   : > { %1210 = vmatprep.subr.bf16.mxu0 %v2320_v10  ;;  %1251 = vmatprep.subr.bf16.mxu1 %v2323_v11 }
 0x487   : > { %1211 = vmatpush1.bf16.msra.mxu0 %v2326_v12  ;;  %1252 = vmatpush1.bf16.msra.mxu1 %v2329_v13 }
 0x488   : > { %1212 = vmatprep.subr.bf16.mxu0 %v2334_v14  ;;  %1253 = vmatprep.subr.bf16.mxu1 %v2339_v15 }
 0x48b   : > { %1213 = vmatpush1.bf16.msra.mxu0 %v2342_v16  ;;  %1254 = vmatpush1.bf16.msra.mxu1 %v2347_v17  ;;  %v1848_v16 = vld [vmem:[%s2274_s28 + $0x28] sm:$0xff] }
 0x48c   : > { %1214 = vmatprep.subr.bf16.mxu0 %v2350_v18  ;;  %1255 = vmatprep.subr.bf16.mxu1 %v2355_v19 }
 0x48f   : > { %1215 = vmatpush1.bf16.msra.mxu0 %v2358_v20  ;;  %1256 = vmatpush1.bf16.msra.mxu1 %v2361_v21 }
 0x490   : > { %1216 = vmatprep.subr.bf16.mxu0 %v2366_v22  ;;  %1257 = vmatprep.subr.bf16.mxu1 %v2371_v23 }
 0x493   : > { %1217 = vmatpush1.bf16.msra.mxu0 %v2374_v24  ;;  %1258 = vmatpush1.bf16.msra.mxu1 %v2379_v25 }
 0x494   : > { %1218 = vmatprep.subr.bf16.mxu0 %v2382_v26  ;;  %1259 = vmatprep.subr.bf16.mxu1 %v2387_v27 }
 0x497   : > { %1219 = vmatpush1.bf16.msra.mxu0 %v2391_v29  ;;  %1260 = vmatpush1.bf16.msra.mxu1 %v2394_v30 }
 0x498   : > { %1220 = vmatprep.subr.bf16.mxu0 %v2397_v33  ;;  %1261 = vmatprep.subr.bf16.mxu1 %v2400_v34 }
 0x49b   : > { %1221 = vmatpush1.bf16.msra.mxu0 %v2407_v37  ;;  %1262 = vmatpush1.bf16.msra.mxu1 %v2412_v38 }
 0x49c   : > { %1345 = vmatprep.subr.bf16.mxu0 %v2288_v1  ;;  %1386 = vmatprep.subr.bf16.mxu1 %v2291_v2 }
 0x551   : > { %v1101_v4 = vpop.f32.mrb[16].mxu0  ;;  %v1142_v5 = vpop.f32.mrb[16].mxu1 }
 0x552   : > { %v1103_v6 = vpop.f32.mrb[17].mxu0  ;;  %v1144_v7 = vpop.f32.mrb[17].mxu1 }
 0x553   : > { %v1153_v8 = vcombine.low %v1101_v4, %v1103_v6  ;;  %v1154_v9 = vcombine.low %v1142_v5, %v1144_v7  ;;  %v1105_v10 = vpop.f32.mrb[18].mxu0  ;;  %v1146_v11 = vpop.f32.mrb[18].mxu1  ;;  %v2166_v4 = vld [vmem:[%s2279_s7 + $0x80] ss:$16 sps:$4 sm:$0xff]   ;;  %v2167_v5 = vld [vmem:[%s2279_s7 + $0x88] ss:$16 sps:$4 sm:$0xff]  }
 0x554   : > { %v1106_v12 = vpop.f32.mrb[19].mxu0  ;;  %v1147_v13 = vpop.f32.mrb[19].mxu1  ;;  %v2168_v6 = vld [vmem:[%s2279_s7 + $0xa4] ss:$16 sps:$4 sm:$0xff]   ;;  %v2169_v7 = vld [vmem:[%s2279_s7 + $0xac] ss:$16 sps:$4 sm:$0xff]  }
 0x555   : > { %v1161_v14 = vrot.slane %v1153_v8, %v2457_v0  ;;  %v1168_v15 = vrot.slane %v1154_v9, %v2457_v0  ;;  %v1852_v13 = vld [vmem:[%s2274_s28 + $0x30] sm:$0xff] }
 0x557   : > { %v1169_v17 = vcombine.low %v1161_v14, %v1168_v15 }
 0x559   : > { %v1171_v18 = vadd.f32 %v1848_v16, %v1169_v17 }
 0x55b   : > { %v1849_v1 = vmul.f32 -1.442695, %v1171_v18  ;;  %v1179_v19 = vrot.slane %v1171_v18, 2  ;;  %v1190_v20 = vrot.slane %v1171_v18, 6  ;;  %v1187_v23 = vrot.slane %v1171_v18, 4 }
 0x55d   : > { %2102 = vpow2.f32 %v1849_v1  ;;  %v1850_v2 = vmul.f32 -1.442695, %v1179_v19  ;;  %v1851_v21 = vmul.f32 -1.442695, %v1190_v20 }
 0x55f   : > { %2104 = vpow2.f32 %v1850_v2 }
 0x560   : > { %2106 = vpow2.f32 %v1851_v21 }
 0x567   : > { %v2103_v22 = vpop.eup %2102 }
 0x568   : > { %v1175_v49 = vadd.f32 1.0, %v2103_v22 }
 0x569   : > { %v2105_v62 = vpop.eup %2104 }
 0x56a   : > { %2108 = vrcp.f32 %v1175_v49  ;;  %v1184_v63 = vadd.f32 1.0, %v2105_v62  ;;  %v2107_v28 = vpop.eup %2106 }
 0x56b   : > { %2110 = vtanh.f32 %v1187_v23  ;;  %v1195_v39 = vadd.f32 1.0, %v2107_v28 }
 0x56c   : > { %2112 = vrcp.f32 %v1184_v63 }
 0x56d   : > { %2114 = vrcp.f32 %v1195_v39 }
 0x574   : > { %v2109_v32 = vpop.eup %2108 }
 0x575   : > { %v2111_v35 = vpop.eup %2110 }
 0x576   : > { %v2113_v36 = vpop.eup %2112  ;;  %v1199_v40 = vmul.f32 %v2111_v35, %v2109_v32 }
 0x577   : > { %v1198_v52 = vmul.f32 %v2113_v36, %v2586_v57  ;;  %v2115_v43 = vpop.eup %2114  ;;  %v2160_v57 = vld [vmem:[%s2279_s7 + $0x64] ss:$16 sps:$4 sm:$0xff]  }
 0x579   : > { %v2627_v41 = vadd.f32 %v1199_v40, %v1198_v52  ;;  %v2014_v40 = vld [vmem:[%s2284_s10] sm:$0xff]  }
 0x57b   : > { %2116 = vtanh.f32 %v2627_v41 }
 0x585   : > { %v2117_v44 = vpop.eup %2116 }
 0x586   : > { %v1202_v45 = vmul.f32 %v2117_v44, %v2115_v43  ;;  %v2219_v43 = vmov 0.0   ;;  %v2016_v44 = vld [vmem:[%s2284_s10 + $0x10] sm:$0xff]  }
 0x588   : > { %v1205_v46 = vpack.c.bf16 %v1202_v45, %v1202_v45  ;;  %v2017_v45 = vld [vmem:[%s2284_s10 + $0x18] sm:$0xff]  }
 0x58a   : > { %1239 = vmatmul.mubr.bf16.vlgmr.msra.gmra.mrb[20].mxu0 %v1205_v46  ;;  %1280 = vmatmul.mubr.bf16.vlgmr.msra.gmra.mrb[20].mxu1 %v1205_v46  ;;  %v2018_v46 = vld [vmem:[%s2284_s10 + $0x20] sm:$0xff]  }
 0x58b   : > { %1346 = vmatpush1.bf16.msra.mxu0 %v2150_v31  ;;  %1387 = vmatpush1.bf16.msra.mxu1 %v2151_v47  ;;  %v2019_v31 = vld [vmem:[%s2284_s10 + $0x28] sm:$0xff]   ;;  %v2020_v47 = vld [vmem:[%s2284_s10 + $0x30] sm:$0xff]  }
 0x58c   : > { %1347 = vmatprep.subr.bf16.mxu0 %v2152_v48  ;;  %1388 = vmatprep.subr.bf16.mxu1 %v2153_v50  ;;  %v2021_v48 = vld [vmem:[%s2284_s10 + $0x38] sm:$0xff]  }
 0x58d   : > { %1377 = vmatprep.mubr.bf16.mxu0 %v2217_v3  ;;  %1418 = vmatprep.mubr.bf16.mxu1 %v2217_v3  ;;  %v2161_v3 = vld [vmem:[%s2279_s7 + $0x6c] ss:$16 sps:$4 sm:$0xff]  }
 0x58f   : > { %1348 = vmatpush1.bf16.msra.mxu0 %v2154_v51  ;;  %1389 = vmatpush1.bf16.msra.mxu1 %v2155_v53 }
 0x590   : > { %1349 = vmatprep.subr.bf16.mxu0 %v2156_v54  ;;  %1390 = vmatprep.subr.bf16.mxu1 %v2157_v42 }
 0x593   : > { %1350 = vmatpush1.bf16.msra.mxu0 %v2158_v55  ;;  %1391 = vmatpush1.bf16.msra.mxu1 %v2159_v56 }
 0x594   : > { %1351 = vmatprep.subr.bf16.mxu0 %v2160_v57  ;;  %1392 = vmatprep.subr.bf16.mxu1 %v2161_v3 }
 0x597   : > { %1352 = vmatpush1.bf16.msra.mxu0 %v2162_v58  ;;  %1393 = vmatpush1.bf16.msra.mxu1 %v2163_v59 }
 0x598   : > { %1353 = vmatprep.subr.bf16.mxu0 %v2164_v60  ;;  %1394 = vmatprep.subr.bf16.mxu1 %v2165_v61  ;;  %v1856_v61 = vld [vmem:[%s2274_s28 + $0x38] sm:$0xff] }
 0x59b   : > { %1354 = vmatpush1.bf16.msra.mxu0 %v2166_v4  ;;  %1395 = vmatpush1.bf16.msra.mxu1 %v2167_v5 }
 0x59c   : > { %1355 = vmatprep.subr.bf16.mxu0 %v2168_v6  ;;  %1396 = vmatprep.subr.bf16.mxu1 %v2169_v7 }
 0x59f   : > { %1356 = vmatpush1.bf16.msra.mxu0 %v2374_v24  ;;  %1397 = vmatpush1.bf16.msra.mxu1 %v2379_v25 }
 0x5a0   : > { %1357 = vmatprep.subr.bf16.mxu0 %v2382_v26  ;;  %1398 = vmatprep.subr.bf16.mxu1 %v2387_v27 }
 0x5a3   : > { %1358 = vmatpush1.bf16.msra.mxu0 %v2391_v29  ;;  %1399 = vmatpush1.bf16.msra.mxu1 %v2394_v30 }
 0x5a4   : > { %1359 = vmatprep.subr.bf16.mxu0 %v2397_v33  ;;  %1400 = vmatprep.subr.bf16.mxu1 %v2400_v34 }
 0x5a7   : > { %1360 = vmatpush1.bf16.msra.mxu0 %v2407_v37  ;;  %1401 = vmatpush1.bf16.msra.mxu1 %v2412_v38 }
 0x5a8   : > { %1904 = vmatprep.subr.bf16.mxu0 %v2219_v43 }
 0x65d   : > { %v1240_v24 = vpop.f32.mrb[20].mxu0  ;;  %v1281_v8 = vpop.f32.mrb[20].mxu1 }
 0x65e   : > { %v1242_v25 = vpop.f32.mrb[21].mxu0  ;;  %v1283_v9 = vpop.f32.mrb[21].mxu1 }
 0x65f   : > { %v1292_v26 = vcombine.low %v1240_v24, %v1242_v25  ;;  %v1293_v10 = vcombine.low %v1281_v8, %v1283_v9  ;;  %v1244_v27 = vpop.f32.mrb[22].mxu0  ;;  %v1285_v11 = vpop.f32.mrb[22].mxu1 }
 0x660   : > { %v1245_v29 = vpop.f32.mrb[23].mxu0  ;;  %v1286_v12 = vpop.f32.mrb[23].mxu1 }
 0x661   : > { %v1300_v30 = vrot.slane %v1292_v26, %v2457_v0  ;;  %v1307_v33 = vrot.slane %v1293_v10, %v2457_v0 }
 0x663   : > { %v1308_v34 = vcombine.low %v1300_v30, %v1307_v33 }
 0x665   : > { %v1310_v14 = vadd.f32 %v1852_v13, %v1308_v34 }
 0x667   : > { %v1853_v37 = vmul.f32 -1.442695, %v1310_v14  ;;  %v1318_v15 = vrot.slane %v1310_v14, 2  ;;  %v1329_v16 = vrot.slane %v1310_v14, 6  ;;  %v1326_v1 = vrot.slane %v1310_v14, 4 }
 0x669   : > { %2118 = vpow2.f32 %v1853_v37  ;;  %v1854_v38 = vmul.f32 -1.442695, %v1318_v15  ;;  %v1855_v17 = vmul.f32 -1.442695, %v1329_v16 }
 0x66b   : > { %2120 = vpow2.f32 %v1854_v38 }
 0x66c   : > { %2122 = vpow2.f32 %v1855_v17  ;;  %v1481_v17 = vld [vmem:[#allocation2] sm:$0x3] }
 0x673   : > { %v2119_v18 = vpop.eup %2118 }
 0x674   : > { %v1314_v19 = vadd.f32 1.0, %v2119_v18 }
 0x675   : > { %v2121_v2 = vpop.eup %2120 }
 0x676   : > { %2124 = vrcp.f32 %v1314_v19  ;;  %v1323_v20 = vadd.f32 1.0, %v2121_v2  ;;  %v2123_v21 = vpop.eup %2122 }
 0x677   : > { %2126 = vtanh.f32 %v1326_v1  ;;  %v1334_v62 = vadd.f32 1.0, %v2123_v21  ;;  %v2170_v21 = vld [vmem:[%s2742_s4] sm:$0xff] (!%p1868_p5)  }
 0x678   : > { %2128 = vrcp.f32 %v1323_v20 }
 0x679   : > { %2130 = vrcp.f32 %v1334_v62  ;;  %v2173_v62 = vld [vmem:[%s2742_s4 + $0x18] sm:$0xff] (!%p1868_p5)  }
 0x680   : > { %v2125_v22 = vpop.eup %2124 }
 0x681   : > { %v2127_v23 = vpop.eup %2126 }
 0x682   : > { %v2129_v49 = vpop.eup %2128  ;;  %v1338_v28 = vmul.f32 %v2127_v23, %v2125_v22  ;;  %v2221_v22 = vmov (!%p1868_p5), 0.0   ;;  %v2171_v23 = vld [vmem:[%s2742_s4 + $0x8] sm:$0xff] (!%p1868_p5)  }
 0x683   : > { %v1337_v63 = vmul.f32 %v2129_v49, %v2627_v41  ;;  %v2131_v35 = vpop.eup %2130  ;;  %v2015_v41 = vld [vmem:[%s2284_s10 + $0x8] sm:$0xff]   ;;  %v2172_v49 = vld [vmem:[%s2742_s4 + $0x10] sm:$0xff] (!%p1868_p5)  }
 0x685   : > { %v2666_v32 = vadd.f32 %v1338_v28, %v1337_v63  ;;  %v2174_v63 = vld [vmem:[%s2742_s4 + $0x20] sm:$0xff] (!%p1868_p5)   ;;  %v2175_v28 = vld [vmem:[%s2742_s4 + $0x28] sm:$0xff] (!%p1868_p5)  }
 0x687   : > { %2132 = vtanh.f32 %v2666_v32 }
 0x691   : > { %v2133_v36 = vpop.eup %2132 }
 0x692   : > { %v1341_v39 = vmul.f32 %v2133_v36, %v2131_v35  ;;  %v1869_v35 = vld [vmem:[%s2741_s3] ss:$0 sm:$0xff] (!%p1868_p5) }
 0x694   : > { %v1344_v52 = vpack.c.bf16 %v1341_v39, %v1341_v39  ;;  %v2176_v39 = vld [vmem:[%s2742_s4 + $0x30] sm:$0xff] (!%p1868_p5)  }
 0x696   : > { %1378 = vmatmul.mubr.bf16.vlgmr.msra.gmra.mrb[24].mxu0 %v1344_v52  ;;  %1419 = vmatmul.mubr.bf16.vlgmr.msra.gmra.mrb[24].mxu1 %v1344_v52 }
 0x697   : > { %1905 = vmatpush3.bf16.msra.mxu0 %v2014_v40  ;;  %1920 = vmatprep.mubr.msk.bf16.mxu0 %vm2220_vm0, %v2219_v43  ;;  %v2177_v40 = vld [vmem:[%s2742_s4 + $0x38] sm:$0xff] (!%p1868_p5)  }
 0x698   : > { %1906 = vmatprep.subr.bf16.mxu0 %v2219_v43 }
 0x69b   : > { %1907 = vmatpush3.bf16.msra.mxu0 %v2015_v41  ;;  %v1870_v41 = vld [vmem:[%s2743_s5] ss:$0 sm:$0xff] (!%p1868_p5) }
 0x69c   : > { %1908 = vmatprep.subr.bf16.mxu0 %v2219_v43 }
 0x69f   : > { %1909 = vmatpush3.bf16.msra.mxu0 %v2016_v44 }
 0x6a0   : > { %1910 = vmatprep.subr.bf16.mxu0 %v2219_v43 }
 0x6a3   : > { %1911 = vmatpush3.bf16.msra.mxu0 %v2017_v45 }
 0x6a4   : > { %1912 = vmatprep.subr.bf16.mxu0 %v2219_v43 }
 0x6a7   : > { %1913 = vmatpush3.bf16.msra.mxu0 %v2018_v46 }
 0x6a8   : > { %1914 = vmatprep.subr.bf16.mxu0 %v2219_v43 }
 0x6ab   : > { %1915 = vmatpush3.bf16.msra.mxu0 %v2019_v31 }
 0x6ac   : > { %1916 = vmatprep.subr.bf16.mxu0 %v2219_v43 }
 0x6af   : > { %1917 = vmatpush3.bf16.msra.mxu0 %v2020_v47 }
 0x6b0   : > { %1918 = vmatprep.subr.bf16.mxu0 %v2219_v43 }
 0x6b3   : > { %1919 = vmatpush3.bf16.msra.mxu0 %v2021_v48 }
 0x6b4   : > { %1924 = vmatprep.subr.bf16.mxu0 (!%p1868_p5), %v2221_v22 }
 0x769   : > { %v1379_v50 = vpop.f32.mrb[24].mxu0  ;;  %v1420_v51 = vpop.f32.mrb[24].mxu1 }
 0x76a   : > { %v1381_v53 = vpop.f32.mrb[25].mxu0  ;;  %v1422_v54 = vpop.f32.mrb[25].mxu1 }
 0x76b   : > { %v1431_v42 = vcombine.low %v1379_v50, %v1381_v53  ;;  %v1432_v55 = vcombine.low %v1420_v51, %v1422_v54  ;;  %v1383_v56 = vpop.f32.mrb[26].mxu0  ;;  %v1424_v57 = vpop.f32.mrb[26].mxu1 }
 0x76c   : > { %v1384_v3 = vpop.f32.mrb[27].mxu0  ;;  %v1425_v58 = vpop.f32.mrb[27].mxu1 }
 0x76d   : > { %v1439_v59 = vrot.slane %v1431_v42, %v2457_v0  ;;  %v1446_v60 = vrot.slane %v1432_v55, %v2457_v0 }
 0x76f   : > { %v1447_v4 = vcombine.low %v1439_v59, %v1446_v60 }
 0x771   : > { %v1449_v5 = vadd.f32 %v1856_v61, %v1447_v4 }
 0x773   : > { %v1857_v6 = vmul.f32 -1.442695, %v1449_v5  ;;  %v1457_v7 = vrot.slane %v1449_v5, 2  ;;  %v1468_v8 = vrot.slane %v1449_v5, 6  ;;  %v1465_v26 = vrot.slane %v1449_v5, 4 }
 0x775   : > { %2134 = vpow2.f32 %v1857_v6  ;;  %v1858_v24 = vmul.f32 -1.442695, %v1457_v7  ;;  %v1859_v25 = vmul.f32 -1.442695, %v1468_v8 }
 0x777   : > { %2136 = vpow2.f32 %v1858_v24 }
 0x778   : > { %2138 = vpow2.f32 %v1859_v25 }
 0x77f   : > { %v2135_v9 = vpop.eup %2134 }
 0x780   : > { %v1453_v10 = vadd.f32 1.0, %v2135_v9 }
 0x781   : > { %v2137_v27 = vpop.eup %2136 }
 0x782   : > { %2140 = vrcp.f32 %v1453_v10  ;;  %v1462_v11 = vadd.f32 1.0, %v2137_v27  ;;  %v2139_v0 = vpop.eup %2138 }
 0x783   : > { %2142 = vtanh.f32 %v1465_v26  ;;  %v1473_v33 = vadd.f32 1.0, %v2139_v0 }
 0x784   : > { %2144 = vrcp.f32 %v1462_v11 }
 0x785   : > { %2146 = vrcp.f32 %v1473_v33 }
 0x78c   : > { %v2141_v29 = vpop.eup %2140 }
 0x78d   : > { %v2143_v12 = vpop.eup %2142 }
 0x78e   : > { %v2145_v30 = vpop.eup %2144  ;;  %v1477_v34 = vmul.f32 %v2143_v12, %v2141_v29 }
 0x78f   : > { %v1476_v13 = vmul.f32 %v2145_v30, %v2666_v32  ;;  %v2147_v37 = vpop.eup %2146 }
 0x791   : > { %v1478_v14 = vadd.f32 %v1477_v34, %v1476_v13 }
 0x793   : > { %2148 = vtanh.f32 %v1478_v14 }
 0x79d   : > { %v2149_v15 = vpop.eup %2148 }
 0x79e   : > { %v1480_v38 = vmul.f32 %v2149_v15, %v2147_v37 }
 0x7a0   : > { %v1482_v16 = vpack.c.bf16 %v1480_v38, %v1480_v38 }
 0x7a2   : > { %1921 = vmatmul.mubr.bf16.vlgmr.msra.gmra.mrb[28].mxu0 %v1482_v16 }
 0x7a3   : > { %1925 = vmatpush3.bf16.msra.mxu0 (!%p1868_p5), %v2170_v21  ;;  %1940 = vmatprep.mubr.msk.bf16.mxu0 (!%p1868_p5), %vm2222_vm1, %v2221_v22 }
 0x7a4   : > { %1926 = vmatprep.subr.bf16.mxu0 (!%p1868_p5), %v2221_v22 }
 0x7a7   : > { %1927 = vmatpush3.bf16.msra.mxu0 (!%p1868_p5), %v2171_v23 }
 0x7a8   : > { %1928 = vmatprep.subr.bf16.mxu0 (!%p1868_p5), %v2221_v22 }
 0x7ab   : > { %1929 = vmatpush3.bf16.msra.mxu0 (!%p1868_p5), %v2172_v49 }
 0x7ac   : > { %1930 = vmatprep.subr.bf16.mxu0 (!%p1868_p5), %v2221_v22 }
 0x7af   : > { %1931 = vmatpush3.bf16.msra.mxu0 (!%p1868_p5), %v2173_v62 }
 0x7b0   : > { %1932 = vmatprep.subr.bf16.mxu0 (!%p1868_p5), %v2221_v22 }
 0x7b3   : > { %1933 = vmatpush3.bf16.msra.mxu0 (!%p1868_p5), %v2174_v63 }
 0x7b4   : > { %1934 = vmatprep.subr.bf16.mxu0 (!%p1868_p5), %v2221_v22 }
 0x7b7   : > { %1935 = vmatpush3.bf16.msra.mxu0 (!%p1868_p5), %v2175_v28 }
 0x7b8   : > { %1936 = vmatprep.subr.bf16.mxu0 (!%p1868_p5), %v2221_v22 }
 0x7bb   : > { %1937 = vmatpush3.bf16.msra.mxu0 (!%p1868_p5), %v2176_v39 }
 0x7bc   : > { %1938 = vmatprep.subr.bf16.mxu0 (!%p1868_p5), %v2221_v22 }
 0x7bf   : > { %1939 = vmatpush3.bf16.msra.mxu0 (!%p1868_p5), %v2177_v40 }
 0x872   : > { %1592 = sbr.rel (%p1868_p5) target bundleno = 2397 (0x95d), region = 52 }
 0x875   : > { %v1581_v18 = vpop.f32.mrb[28].mxu0 }
 0x876   : > { %v1587_v1 = vadd.f32 %v1581_v18, %v1481_v17  ;;  %v1922_v19 = vpop.f32.mrb[29].mxu0 }
 0x877   : > { %v1584_v2 = vpop.f32.mrb[30].mxu0 }
 0x878   : > { %1588 = vst [vmem:[#allocation2] sm:$0x3] %v1587_v1  ;;  %v1923_v20 = vpop.f32.mrb[31].mxu0 }
 0x87f   : > { %v1593_v32 = vld [vmem:[#allocation2] sm:$0x3] }
 0x880   : > { %v1601_v36 = vadd.f32 %v1869_v35, %v1593_v32 }
 0x882   : > { %v1602_v52 = vmax.f32 %v1601_v36, 0.0 }
 0x884   : > { %v1603_v43 = vpack.c.bf16 %v1602_v52, %v1602_v52 }
 0x886   : > { %1941 = vmatmul.mubr.bf16.vlgmr.msra.gmra.mrb[0].mxu0 %v1603_v43 }
 0x959   : > { %v1709_v44 = vpop.f32.mrb[0].mxu0 }
 0x95a   : > { %v1710_v45 = vadd.f32 %v1870_v41, %v1709_v44  ;;  %v1942_v46 = vpop.f32.mrb[1].mxu0 }
 0x95b   : > { %v1712_v31 = vpop.f32.mrb[2].mxu0 }
 0x95c   : > { %1715 = vst [vmem:[#allocation3] sm:$0x3] %v1710_v45  ;;  %v1943_v47 = vpop.f32.mrb[3].mxu0 }
 0x95d PF: > { %p1948_p6 = scmp.eq.s32.totalorder %s2265_s22, 2  ;;  %s2223_s9 = smov [#allocation3]  }
 0x95e   : > { %s1723_s10 = sshll.u32 %s2223_s9, 4  ;;  %s1724_s10 = int_to_ptr.vmem [resolvable:$true] %s1723_s10 }
 0x95f   : > { %s2178_s11 = scalar_lea.vmem %s1724_s10, 32  ;;  %p2185_p10 = scmp.lt.s32.totalorder %s1724_s10, %s1724_s10 }
 0x960   : > { %p2179_p7 = scmp.ne.s32.totalorder %s1724_s10, %s2178_s11  ;;  %p2186_p11 = scmp.lt.s32.totalorder %s2178_s11, %s2178_s11 }
 0x962   : > { %p2180_p8 = pnand %p2179_p7, %p1948_p6  ;;  %p2187_p12 = por %p2186_p11, %p2185_p10 }
 0x964   : > { %p2181_p9 = pneg %p2180_p8 }
 0x966   : > { %p2188_p13 = pnand %p2187_p12, %p2181_p9 }
 0x968   : > { %2191 = shalt.err (!%p2188_p13)
}
 0x969   : > { %s2192_s14 = scalar_lea.hbm %s2744_s6, 32 }
 0x96a   : > { %p2193_p0 = scmp.ne.s32.totalorder %s2744_s6, %s2192_s14  ;;  %p2198_p3 = scmp.lt.u32.totalorder %s2192_s14, %s2744_s6 }
 0x96c   : > { %p2194_p1 = pnand %p2193_p0, %p1948_p6 }
 0x96e   : > { %p2195_p2 = pneg %p2194_p1 }
 0x970   : > { %p2200_p4 = pnand %p2198_p3, %p2195_p2 }
 0x972   : > { %2203 = shalt.err (!%p2200_p4)
}
 0x973   : > { %1945 = dma.vmem_to_hbm [thread:$0]  (%p1948_p6), %s1724_s10, 32, %s2744_s6, [#allocation4]  }
 0x974   : > { %2209 = dma.done.wait (%p1948_p6), [#allocation4], 32  }
 0x975   : > { %2211 = vsyncadd (%p1948_p6), [#allocation4], 4294967264 }
 0x976 PF: > { %s17_s21 = sadd.s32 1, %s2214_s21  }
 0x977   : > { %p14_p5 = scmp.ge.s32.totalorder %s17_s21, 5  }
 0x979   :  { %16 = sbr.rel (!%p14_p5) target bundleno = 1 (0x1), region = 92 }
 0x980   :  { %1736 = vsyncpa [#allocation4], 1 }
 0x981   :  { %1738 = vsyncpa [#allocation4 + $0x1], 1 }

</bundles_post_ra>
